<compile_context>
chip_gen: v7x
topology: tpu7x:2x2x1
jax: 0.10.0
libtpu: 0.0.40
codegen_flags: <defaults>
</compile_context>

<pallas_src>
import functools
import math

import jax
import jax.numpy as jnp
from jax.experimental import pallas as pl
from jax.experimental.pallas import tpu as pltpu


def _int_pow(x, n):
    """x ** n for integer n >= 1 via square-and-multiply."""
    result = None
    base = x
    while n:
        if n & 1:
            result = base if result is None else result * base
        n >>= 1
        if n:
            base = base * base
    return result


def _fpow(x, p):
    """x ** p for x >= 0 without relying on lax.pow lowering."""
    p = float(p)
    if p == 1.0:
        return x
    if p == int(p) and 1 < int(p) <= 16:
        return _int_pow(x, int(p))
    return jnp.exp(p * jnp.log(x))


def _tal_kernel(pd_scores_t_ref, pd_bboxes_t_ref, anc_t_ref, gt_labels_ref,
                gt_bboxes_ref, mask_gt_ref, gt_atan_ref, pd_atan_ref,
                tl_ref, tb_ref, ts_ref, fg_ref, tgi_ref,
                *, topk, num_classes, alpha, beta, eps,
                n_max_boxes, n_anchors_pad, n_anchors_valid):
    f32 = jnp.float32
    i32 = jnp.int32
    bf16 = jnp.bfloat16
    nm, na, nc = n_max_boxes, n_anchors_pad, num_classes
    ieps = 1e-7  # bbox_iou eps (torch default)

    ps = pd_scores_t_ref[0]      # (nc, na) logits, lane-dense
    pbt = pd_bboxes_t_ref[0]     # (4, na)
    anc = anc_t_ref[...]         # (2, na)
    gl = gt_labels_ref[0]        # (nm, 1) int32
    gb = gt_bboxes_ref[0]        # (nm, 4) f32
    mgt = mask_gt_ref[0]         # (nm, 1) f32
    gt_atan = gt_atan_ref[0]     # (nm, 1) f32
    pd_atan = pd_atan_ref[0]     # (1, na) f32

    ax = anc[0:1, :]             # (1, na)
    ay = anc[1:2, :]
    gx1, gy1, gx2, gy2 = gb[:, 0:1], gb[:, 1:2], gb[:, 2:3], gb[:, 3:4]      # (nm, 1)
    px1, py1, px2, py2 = pbt[0:1, :], pbt[1:2, :], pbt[2:3, :], pbt[3:4, :]  # (1, na)

    # anchor-lane validity: pad lanes (>= n_anchors_valid) are dead.
    lane_valid = jax.lax.broadcasted_iota(i32, (1, na), 1) < n_anchors_valid  # (1, na) bool

    # ---------------- select_candidates_in_gts --------------------------------
    # torch's select_candidates_in_gts always uses its static default eps=1e-9.
    deltas_min = jnp.minimum(jnp.minimum(ax - gx1, ay - gy1),
                             jnp.minimum(gx2 - ax, gy2 - ay))                 # (nm, na)
    maskb = (jnp.logical_and(deltas_min > 1e-9, mgt > 0.0)
             & lane_valid).astype(f32)                                        # (nm, na)

    # ---------------- get_box_metrics: BCE classification score ---------------
    # BCEWithLogits(x, onehot).sum(-1) = sum_c softplus(x_c) - x_label
    # TODO(synk): optionally run the exp/log below in bf16 on v6e/v7x (bf16 EUP);
    # kept f32 here so the same kernel is exact-ish on v5e.
    softplus = jnp.maximum(ps, 0.0) + jnp.log(1.0 + jnp.exp(-jnp.abs(ps)))    # (nc, na)
    ones_b = jnp.ones((1, nc), bf16)
    s_sum = jax.lax.dot_general(ones_b, softplus.astype(bf16),
                                (((1,), (0,)), ((), ())),
                                preferred_element_type=f32)                   # (1, na)
    onehot_b = (jax.lax.broadcasted_iota(i32, (nm, nc), 1) == gl).astype(bf16)
    x_label = jax.lax.dot_general(onehot_b, ps.astype(bf16),
                                  (((1,), (0,)), ((), ())),
                                  preferred_element_type=f32)                 # (nm, na)
    bbox_scores = jnp.exp(x_label - s_sum)                                    # exp(-bce_sum)

    # ---------------- get_box_metrics: CIoU overlaps ---------------------------
    w1 = gx2 - gx1
    h1 = gy2 - gy1 + ieps
    w2 = px2 - px1
    h2 = py2 - py1 + ieps
    inter = (jnp.maximum(jnp.minimum(gx2, px2) - jnp.maximum(gx1, px1), 0.0) *
             jnp.maximum(jnp.minimum(gy2, py2) - jnp.maximum(gy1, py1), 0.0))
    union = w1 * h1 + w2 * h2 - inter + ieps
    iou = inter / union
    cw = jnp.maximum(gx2, px2) - jnp.minimum(gx1, px1)
    ch = jnp.maximum(gy2, py2) - jnp.minimum(gy1, py1)
    c2 = cw * cw + ch * ch + ieps
    dx = px1 + px2 - gx1 - gx2
    dy = py1 + py2 - gy1 - gy2
    rho2 = (dx * dx + dy * dy) * 0.25
    da = pd_atan - gt_atan                                                    # atan(w2/h2)-atan(w1/h1)
    v = (4.0 / (math.pi ** 2)) * (da * da)
    a_ciou = v / (v - iou + (1.0 + ieps))
    ciou = iou - (rho2 / c2 + v * a_ciou)
    overlaps = jnp.maximum(ciou, 0.0) * maskb                                 # (nm, na)

    align_metric = _fpow(bbox_scores, alpha) * _fpow(overlaps, beta) * maskb  # (nm, na)

    # ---------------- select_topk_candidates -----------------------------------
    # Fused max+argmax per iteration: pack (value bits | reversed lane index)
    # into one int32 key.  Metric is >= 0 so the f32 bit pattern is
    # order-preserving; pad lanes get -1.0 so real anchors always win ties.
    idx_bits = max(1, (na - 1).bit_length())
    idx_mask = (1 << idx_bits) - 1
    lane_rank = idx_mask - jax.lax.broadcasted_iota(i32, (nm, na), 1)         # (nm, na)
    work = jnp.where(lane_valid, align_metric, -1.0)
    key = jnp.bitwise_or(jnp.bitwise_and(pltpu.bitcast(work, i32),
                                         jnp.int32(~idx_mask)), lane_rank)
    neg_key = jnp.int32(-2 ** 31)
    topk_cnt = jnp.zeros((nm, na), f32)
    for _ in range(topk):
        kmax = jnp.max(key, axis=-1, keepdims=True)                           # (nm, 1)
        sel = key == kmax                                                     # unique per row
        topk_cnt = topk_cnt + sel.astype(f32)
        key = jnp.where(sel, neg_key, key)
    # Invalid gt rows / out-of-box anchors are removed by maskb (matches torch,
    # where invalid rows collapse to a count>1 at index 0 and are zeroed).
    mask_pos = topk_cnt * maskb                                               # (nm, na)

    # ---------------- select_highest_overlaps ----------------------------------
    gt_bits = max(1, (nm - 1).bit_length())
    gt_mask_i = (1 << gt_bits) - 1
    row_rank = gt_mask_i - jax.lax.broadcasted_iota(i32, (nm, na), 0)         # (nm, na)
    fg = jnp.sum(mask_pos, axis=0, keepdims=True)                             # (1, na)
    multi = fg > 1.0
    okey = jnp.bitwise_or(jnp.bitwise_and(pltpu.bitcast(overlaps, i32),
                                          jnp.int32(~gt_mask_i)), row_rank)
    is_max_ov = (okey == jnp.max(okey, axis=0, keepdims=True)).astype(f32)    # one-hot over gt
    mask_pos = jnp.where(multi, is_max_ov, mask_pos)
    fg = jnp.where(multi, 1.0, fg)     # replaced columns have exactly one positive
    pkey = mask_pos.astype(i32) * (gt_mask_i + 1) + row_rank                  # (nm, na)
    pmax = jnp.max(pkey, axis=0, keepdims=True)                               # (1, na)
    tgi = gt_mask_i - jnp.bitwise_and(pmax, gt_mask_i)                        # argmax (first max)
    sel_gt = (pkey == pmax).astype(f32)                                       # one-hot over gt dim

    # ---------------- get_targets (single MXU gather) ---------------------------
    # rows 0..3: target bbox coords, row 4: target label (small ints, exact in f32)
    gmat = jnp.concatenate([gb, gl.astype(f32)], axis=1)                      # (nm, 5)
    tbl = jax.lax.dot_general(gmat, sel_gt, (((0,), (0,)), ((), ())),
                              preferred_element_type=f32)                     # (5, na)
    tb_ref[0] = tbl[0:4, :]
    tl = jnp.maximum(tbl[4:5, :].astype(i32), 0)                              # clamp_(0)

    # ---------------- normalization + target_scores (fused) --------------------
    align2 = align_metric * mask_pos
    pos_align = jnp.max(align2, axis=-1, keepdims=True)                       # (nm, 1)
    pos_ov = jnp.max(overlaps * mask_pos, axis=-1, keepdims=True)             # (nm, 1)
    norm = jnp.max(align2 * (pos_ov / (pos_align + eps)),
                   axis=0, keepdims=True)                                     # (1, na)
    cls_iota = jax.lax.broadcasted_iota(i32, (nc, na), 0)
    ts_ref[0] = jnp.where(jnp.logical_and(cls_iota == tl, fg > 0.0), norm, 0.0)

    tl_ref[0] = tl
    fg_ref[0] = fg
    tgi_ref[0] = tgi


def task_aligned_assigner_bce(pd_scores, pd_bboxes, anc_points, gt_labels,
                              gt_bboxes, mask_gt, *, topk=13, num_classes=80,
                              alpha=1.0, beta=6.0, eps=1e-9):
    bs, na, nc = pd_scores.shape
    nm = gt_bboxes.shape[1]
    assert nc == num_classes
    assert na >= topk

    if nm == 0:
        return (jnp.full((bs, na), num_classes, jnp.int32),
                jnp.zeros_like(pd_bboxes),
                jnp.zeros_like(pd_scores),
                jnp.zeros((bs, na), bool),
                jnp.zeros((bs, na), jnp.int32))

    f32 = jnp.float32
    pd_scores = pd_scores.astype(f32)
    pd_bboxes = pd_bboxes.astype(f32)
    gt_bboxes = gt_bboxes.astype(f32)
    ieps = 1e-7

    # pad anchor axis to a multiple of 128 -> lane-dense, unmasked stores
    na_pad = ((na + 127) // 128) * 128
    pad = na_pad - na

    # ---- glue: layout prep + per-box arctan (atan has no guaranteed Mosaic lowering) ----
    pd_scores_t = jnp.transpose(pd_scores, (0, 2, 1))                     # (bs, nc, na)
    pd_bboxes_t = jnp.transpose(pd_bboxes, (0, 2, 1))                     # (bs, 4, na)
    anc_t = jnp.transpose(anc_points.astype(f32), (1, 0))                 # (2, na)
    gt_atan = jnp.arctan((gt_bboxes[..., 2] - gt_bboxes[..., 0]) /
                         (gt_bboxes[..., 3] - gt_bboxes[..., 1] + ieps))[..., None]   # (bs, nm, 1)
    pd_atan = jnp.arctan((pd_bboxes[..., 2] - pd_bboxes[..., 0]) /
                         (pd_bboxes[..., 3] - pd_bboxes[..., 1] + ieps))[:, None, :]  # (bs, 1, na)
    if pad:
        pd_scores_t = jnp.pad(pd_scores_t, ((0, 0), (0, 0), (0, pad)))
        pd_bboxes_t = jnp.pad(pd_bboxes_t, ((0, 0), (0, 0), (0, pad)))
        anc_t = jnp.pad(anc_t, ((0, 0), (0, pad)))
        pd_atan = jnp.pad(pd_atan, ((0, 0), (0, 0), (0, pad)))
    gt_labels_i = gt_labels.reshape(bs, nm, 1).astype(jnp.int32)
    mask_gt_f = mask_gt.reshape(bs, nm, 1).astype(f32)

    kernel = functools.partial(_tal_kernel, topk=topk, num_classes=nc,
                               alpha=alpha, beta=beta, eps=eps,
                               n_max_boxes=nm, n_anchors_pad=na_pad,
                               n_anchors_valid=na)

    out_shapes = (
        jax.ShapeDtypeStruct((bs, 1, na_pad), jnp.int32),    # target_labels
        jax.ShapeDtypeStruct((bs, 4, na_pad), f32),          # target_bboxes (transposed)
        jax.ShapeDtypeStruct((bs, nc, na_pad), f32),         # target_scores (transposed)
        jax.ShapeDtypeStruct((bs, 1, na_pad), f32),          # fg_mask (float)
        jax.ShapeDtypeStruct((bs, 1, na_pad), jnp.int32),    # target_gt_idx
    )
    in_specs = [
        pl.BlockSpec((1, nc, na_pad), lambda b: (b, 0, 0)),  # pd_scores_t
        pl.BlockSpec((1, 4, na_pad), lambda b: (b, 0, 0)),   # pd_bboxes_t
        pl.BlockSpec((2, na_pad), lambda b: (0, 0)),         # anc_t (shared)
        pl.BlockSpec((1, nm, 1), lambda b: (b, 0, 0)),       # gt_labels
        pl.BlockSpec((1, nm, 4), lambda b: (b, 0, 0)),       # gt_bboxes
        pl.BlockSpec((1, nm, 1), lambda b: (b, 0, 0)),       # mask_gt
        pl.BlockSpec((1, nm, 1), lambda b: (b, 0, 0)),       # gt_atan
        pl.BlockSpec((1, 1, na_pad), lambda b: (b, 0, 0)),   # pd_atan
    ]
    out_specs = (
        pl.BlockSpec((1, 1, na_pad), lambda b: (b, 0, 0)),
        pl.BlockSpec((1, 4, na_pad), lambda b: (b, 0, 0)),
        pl.BlockSpec((1, nc, na_pad), lambda b: (b, 0, 0)),
        pl.BlockSpec((1, 1, na_pad), lambda b: (b, 0, 0)),
        pl.BlockSpec((1, 1, na_pad), lambda b: (b, 0, 0)),
    )

    # VMEM budget: double-buffered input/output blocks + internal (nm, na) scratch.
    block_bytes = 4 * (2 * nc * na_pad + 10 * na_pad + 6 * nm)
    internal_bytes = 4 * 8 * nm * na_pad
    vmem_limit = int(min(max(2 * block_bytes + 2 * internal_bytes, 16 * 2 ** 20),
                         100 * 2 ** 20))

    tl, tb, ts, fg, tgi = pl.pallas_call(
        kernel,
        out_shape=out_shapes,
        grid_spec=pltpu.PrefetchScalarGridSpec(
            num_scalar_prefetch=0,
            grid=(bs,),
            in_specs=in_specs,
            out_specs=out_specs),
        compiler_params=pltpu.CompilerParams(
            dimension_semantics=("parallel",),   # images are independent (v7x: 2 TCs)
            vmem_limit_bytes=vmem_limit),
    )(pd_scores_t, pd_bboxes_t, anc_t, gt_labels_i, gt_bboxes, mask_gt_f,
      gt_atan, pd_atan)

    target_labels = tl[:, 0, :na]                              # (bs, na) int32
    target_bboxes = jnp.transpose(tb[:, :, :na], (0, 2, 1))    # (bs, na, 4)
    target_scores = jnp.transpose(ts[:, :, :na], (0, 2, 1))    # (bs, na, nc)
    fg_mask = fg[:, 0, :na] > 0                                # (bs, na) bool
    target_gt_idx = tgi[:, 0, :na]                             # (bs, na) int32
    return target_labels, target_bboxes, target_scores, fg_mask, target_gt_idx


if __name__ == "__main__":
    key = jax.random.PRNGKey(0)
    bs, nc, nm, topk = 2, 80, 8, 13
    g = 16
    na = g * g  # 256 anchors

    k1, k2, k3, k4, k5, k6 = jax.random.split(key, 6)

    ys, xs = jnp.meshgrid(jnp.arange(g, dtype=jnp.float32) + 0.5,
                          jnp.arange(g, dtype=jnp.float32) + 0.5, indexing="ij")
    anc_points = jnp.stack([xs.reshape(-1), ys.reshape(-1)], axis=-1)     # (na, 2)

    pd_scores = jax.random.normal(k1, (bs, na, nc), jnp.float32)

    wh = jax.random.uniform(k2, (bs, na, 2), minval=1.0, maxval=5.0)
    ctr = anc_points[None] + 0.5 * jax.random.normal(k3, (bs, na, 2))
    pd_bboxes = jnp.concatenate([ctr - wh / 2, ctr + wh / 2], axis=-1)    # (bs, na, 4)

    xy1 = jax.random.uniform(k4, (bs, nm, 2), minval=0.0, maxval=10.0)
    gwh = jax.random.uniform(k5, (bs, nm, 2), minval=2.0, maxval=6.0)
    gt_bboxes = jnp.concatenate([xy1, xy1 + gwh], axis=-1)                # (bs, nm, 4)
    gt_labels = jax.random.randint(k6, (bs, nm, 1), 0, nc)                # (bs, nm, 1)
    valid_counts = jnp.array([5, 3])
    mask_gt = (jnp.arange(nm)[None, :, None] <
               valid_counts[:, None, None]).astype(jnp.float32)           # (bs, nm, 1)

    outs = task_aligned_assigner_bce(pd_scores, pd_bboxes, anc_points,
                                     gt_labels, gt_bboxes, mask_gt,
                                     topk=topk, num_classes=nc)
    outs = jax.block_until_ready(outs)
    t_labels, t_bboxes, t_scores, fg_mask, t_gt_idx = outs

    assert t_labels.shape == (bs, na)
    assert t_bboxes.shape == (bs, na, 4)
    assert t_scores.shape == (bs, na, nc)
    assert fg_mask.shape == (bs, na) and fg_mask.dtype == jnp.bool_
    assert t_gt_idx.shape == (bs, na)
    assert bool(jnp.all(jnp.isfinite(t_scores)))
    assert bool(jnp.all(jnp.isfinite(t_bboxes)))
    assert bool(jnp.all(t_gt_idx >= 0)) and bool(jnp.all(t_gt_idx < nm))
    print("KERNEL_OK")
</pallas_src>

<mosaic_0001>
module attributes {stable_mosaic.version = 11 : i64} {
  func.func @_tal_kernel(%arg0: i32, %arg1: memref<1x80x256xf32, #tpu.memory_space<vmem>>, %arg2: memref<1x4x256xf32, #tpu.memory_space<vmem>>, %arg3: memref<2x256xf32, #tpu.memory_space<vmem>>, %arg4: memref<1x8x1xi32, #tpu.memory_space<vmem>>, %arg5: memref<1x8x4xf32, #tpu.memory_space<vmem>>, %arg6: memref<1x8x1xf32, #tpu.memory_space<vmem>>, %arg7: memref<1x8x1xf32, #tpu.memory_space<vmem>>, %arg8: memref<1x1x256xf32, #tpu.memory_space<vmem>>, %arg9: memref<1x1x256xi32, #tpu.memory_space<vmem>>, %arg10: memref<1x4x256xf32, #tpu.memory_space<vmem>>, %arg11: memref<1x80x256xf32, #tpu.memory_space<vmem>>, %arg12: memref<1x1x256xf32, #tpu.memory_space<vmem>>, %arg13: memref<1x1x256xi32, #tpu.memory_space<vmem>>) attributes {dimension_semantics = [#tpu.dimension_semantics<parallel>], iteration_bounds = array<i64: 2>, scalar_prefetch = 0 : i64, scratch_operands = 0 : i64, tpu.core_type = #tpu.core_type<tc>, window_params = [{transform_indices = @transform_0, window_bounds = array<i64: 1, 80, 256>}, {transform_indices = @transform_1, window_bounds = array<i64: 1, 4, 256>}, {pipeline_mode = #tpu.pipeline_mode<synchronous>, transform_indices = @transform_2, window_bounds = array<i64: 2, 256>}, {transform_indices = @transform_3, window_bounds = array<i64: 1, 8, 1>}, {transform_indices = @transform_4, window_bounds = array<i64: 1, 8, 4>}, {transform_indices = @transform_5, window_bounds = array<i64: 1, 8, 1>}, {transform_indices = @transform_6, window_bounds = array<i64: 1, 8, 1>}, {transform_indices = @transform_7, window_bounds = array<i64: 1, 1, 256>}, {transform_indices = @transform_8, window_bounds = array<i64: 1, 1, 256>}, {transform_indices = @transform_9, window_bounds = array<i64: 1, 4, 256>}, {transform_indices = @transform_10, window_bounds = array<i64: 1, 80, 256>}, {transform_indices = @transform_11, window_bounds = array<i64: 1, 1, 256>}, {transform_indices = @transform_12, window_bounds = array<i64: 1, 1, 256>}]} {
    %c0 = arith.constant 0 : index
    %c0_0 = arith.constant 0 : index
    %c0_1 = arith.constant 0 : index
    %0 = vector.load %arg1[%c0, %c0_0, %c0_1] : memref<1x80x256xf32, #tpu.memory_space<vmem>>, vector<1x80x256xf32>
    %1 = vector.shape_cast %0 : vector<1x80x256xf32> to vector<80x256xf32>
    %c0_2 = arith.constant 0 : index
    %c0_3 = arith.constant 0 : index
    %c0_4 = arith.constant 0 : index
    %2 = vector.load %arg2[%c0_2, %c0_3, %c0_4] : memref<1x4x256xf32, #tpu.memory_space<vmem>>, vector<1x4x256xf32>
    %3 = vector.shape_cast %2 : vector<1x4x256xf32> to vector<4x256xf32>
    %c0_5 = arith.constant 0 : index
    %c0_6 = arith.constant 0 : index
    %4 = vector.load %arg3[%c0_5, %c0_6] : memref<2x256xf32, #tpu.memory_space<vmem>>, vector<2x256xf32>
    %c0_7 = arith.constant 0 : index
    %c0_8 = arith.constant 0 : index
    %c0_9 = arith.constant 0 : index
    %5 = vector.load %arg4[%c0_7, %c0_8, %c0_9] : memref<1x8x1xi32, #tpu.memory_space<vmem>>, vector<1x8x1xi32>
    %6 = vector.shape_cast %5 : vector<1x8x1xi32> to vector<8x1xi32>
    %c0_10 = arith.constant 0 : index
    %c0_11 = arith.constant 0 : index
    %c0_12 = arith.constant 0 : index
    %7 = vector.load %arg5[%c0_10, %c0_11, %c0_12] : memref<1x8x4xf32, #tpu.memory_space<vmem>>, vector<1x8x4xf32>
    %8 = vector.shape_cast %7 : vector<1x8x4xf32> to vector<8x4xf32>
    %c0_13 = arith.constant 0 : index
    %c0_14 = arith.constant 0 : index
    %c0_15 = arith.constant 0 : index
    %9 = vector.load %arg6[%c0_13, %c0_14, %c0_15] : memref<1x8x1xf32, #tpu.memory_space<vmem>>, vector<1x8x1xf32>
    %10 = vector.shape_cast %9 : vector<1x8x1xf32> to vector<8x1xf32>
    %c0_16 = arith.constant 0 : index
    %c0_17 = arith.constant 0 : index
    %c0_18 = arith.constant 0 : index
    %11 = vector.load %arg7[%c0_16, %c0_17, %c0_18] : memref<1x8x1xf32, #tpu.memory_space<vmem>>, vector<1x8x1xf32>
    %12 = vector.shape_cast %11 : vector<1x8x1xf32> to vector<8x1xf32>
    %c0_19 = arith.constant 0 : index
    %c0_20 = arith.constant 0 : index
    %c0_21 = arith.constant 0 : index
    %13 = vector.load %arg8[%c0_19, %c0_20, %c0_21] : memref<1x1x256xf32, #tpu.memory_space<vmem>>, vector<1x1x256xf32>
    %14 = vector.shape_cast %13 : vector<1x1x256xf32> to vector<1x256xf32>
    %15 = vector.extract_strided_slice %4 {offsets = [0, 0], sizes = [1, 256], strides = [1, 1]} : vector<2x256xf32> to vector<1x256xf32>
    %16 = vector.extract_strided_slice %4 {offsets = [1, 0], sizes = [1, 256], strides = [1, 1]} : vector<2x256xf32> to vector<1x256xf32>
    %17 = vector.extract_strided_slice %8 {offsets = [0, 0], sizes = [8, 1], strides = [1, 1]} : vector<8x4xf32> to vector<8x1xf32>
    %18 = vector.extract_strided_slice %8 {offsets = [0, 1], sizes = [8, 1], strides = [1, 1]} : vector<8x4xf32> to vector<8x1xf32>
    %19 = vector.extract_strided_slice %8 {offsets = [0, 2], sizes = [8, 1], strides = [1, 1]} : vector<8x4xf32> to vector<8x1xf32>
    %20 = vector.extract_strided_slice %8 {offsets = [0, 3], sizes = [8, 1], strides = [1, 1]} : vector<8x4xf32> to vector<8x1xf32>
    %21 = vector.extract_strided_slice %3 {offsets = [0, 0], sizes = [1, 256], strides = [1, 1]} : vector<4x256xf32> to vector<1x256xf32>
    %22 = vector.extract_strided_slice %3 {offsets = [1, 0], sizes = [1, 256], strides = [1, 1]} : vector<4x256xf32> to vector<1x256xf32>
    %23 = vector.extract_strided_slice %3 {offsets = [2, 0], sizes = [1, 256], strides = [1, 1]} : vector<4x256xf32> to vector<1x256xf32>
    %24 = vector.extract_strided_slice %3 {offsets = [3, 0], sizes = [1, 256], strides = [1, 1]} : vector<4x256xf32> to vector<1x256xf32>
    %25 = tpu.iota {dimensions = array<i32: 1>} : vector<1x256xi32>
    %c256_i32 = arith.constant 256 : i32
    %26 = vector.broadcast %c256_i32 : i32 to vector<1x256xi32>
    %27 = arith.cmpi slt, %25, %26 : vector<1x256xi32>
    %28 = vector.broadcast %15 : vector<1x256xf32> to vector<8x256xf32>
    %29 = vector.broadcast %17 : vector<8x1xf32> to vector<8x256xf32>
    %30 = arith.subf %28, %29 : vector<8x256xf32>
    %31 = vector.broadcast %16 : vector<1x256xf32> to vector<8x256xf32>
    %32 = vector.broadcast %18 : vector<8x1xf32> to vector<8x256xf32>
    %33 = arith.subf %31, %32 : vector<8x256xf32>
    %34 = arith.minimumf %30, %33 : vector<8x256xf32>
    %35 = vector.broadcast %19 : vector<8x1xf32> to vector<8x256xf32>
    %36 = vector.broadcast %15 : vector<1x256xf32> to vector<8x256xf32>
    %37 = arith.subf %35, %36 : vector<8x256xf32>
    %38 = vector.broadcast %20 : vector<8x1xf32> to vector<8x256xf32>
    %39 = vector.broadcast %16 : vector<1x256xf32> to vector<8x256xf32>
    %40 = arith.subf %38, %39 : vector<8x256xf32>
    %41 = arith.minimumf %37, %40 : vector<8x256xf32>
    %42 = arith.minimumf %34, %41 : vector<8x256xf32>
    %cst = arith.constant 9.99999971E-10 : f32
    %43 = vector.broadcast %cst : f32 to vector<8x256xf32>
    %44 = arith.cmpf ogt, %42, %43 : vector<8x256xf32>
    %cst_22 = arith.constant 0.000000e+00 : f32
    %45 = vector.broadcast %cst_22 : f32 to vector<8x1xf32>
    %46 = arith.cmpf ogt, %10, %45 : vector<8x1xf32>
    %47 = vector.broadcast %46 : vector<8x1xi1> to vector<8x256xi1>
    %48 = arith.andi %44, %47 : vector<8x256xi1>
    %49 = vector.broadcast %27 : vector<1x256xi1> to vector<8x256xi1>
    %50 = arith.andi %48, %49 : vector<8x256xi1>
    %51 = arith.extui %50 : vector<8x256xi1> to vector<8x256xi32>
    %52 = arith.sitofp %51 : vector<8x256xi32> to vector<8x256xf32>
    %cst_23 = arith.constant 0.000000e+00 : f32
    %53 = vector.broadcast %cst_23 : f32 to vector<80x256xf32>
    %54 = arith.maximumf %1, %53 : vector<80x256xf32>
    %55 = math.absf %1 : vector<80x256xf32>
    %cst_24 = arith.constant 0.000000e+00 : f32
    %56 = vector.broadcast %cst_24 : f32 to vector<80x256xf32>
    %57 = arith.subf %56, %55 : vector<80x256xf32>
    %58 = math.exp %57 : vector<80x256xf32>
    %cst_25 = arith.constant 1.000000e+00 : f32
    %59 = vector.broadcast %cst_25 : f32 to vector<80x256xf32>
    %60 = arith.addf %59, %58 : vector<80x256xf32>
    %61 = math.log %60 : vector<80x256xf32>
    %62 = arith.addf %54, %61 : vector<80x256xf32>
    %cst_26 = arith.constant 1.000000e+00 : bf16
    %63 = vector.broadcast %cst_26 : bf16 to vector<1x80xbf16>
    %64 = arith.truncf %62 : vector<80x256xf32> to vector<80x256xbf16>
    %cst_27 = arith.constant dense<0.000000e+00> : vector<1x256xf32>
    %65 = tpu.matmul %63, %64, %cst_27 {dimension_numbers = #tpu.dot_dimension_numbers<[1], [0], [0], [1], [0, 0, 1, 1], [], []>} : vector<1x80xbf16>, vector<80x256xbf16>, vector<1x256xf32> -> vector<1x256xf32>
    %66 = tpu.iota {dimensions = array<i32: 1>} : vector<8x80xi32>
    %67 = vector.broadcast %6 : vector<8x1xi32> to vector<8x80xi32>
    %68 = arith.cmpi eq, %66, %67 : vector<8x80xi32>
    %69 = arith.extui %68 : vector<8x80xi1> to vector<8x80xi32>
    %70 = arith.sitofp %69 : vector<8x80xi32> to vector<8x80xf32>
    %71 = arith.truncf %70 : vector<8x80xf32> to vector<8x80xbf16>
    %72 = arith.truncf %1 : vector<80x256xf32> to vector<80x256xbf16>
    %cst_28 = arith.constant dense<0.000000e+00> : vector<8x256xf32>
    %73 = tpu.matmul %71, %72, %cst_28 {dimension_numbers = #tpu.dot_dimension_numbers<[1], [0], [0], [1], [0, 0, 1, 1], [], []>} : vector<8x80xbf16>, vector<80x256xbf16>, vector<8x256xf32> -> vector<8x256xf32>
    %74 = vector.broadcast %65 : vector<1x256xf32> to vector<8x256xf32>
    %75 = arith.subf %73, %74 : vector<8x256xf32>
    %76 = math.exp %75 : vector<8x256xf32>
    %77 = arith.subf %19, %17 : vector<8x1xf32>
    %78 = arith.subf %20, %18 : vector<8x1xf32>
    %cst_29 = arith.constant 1.000000e-07 : f32
    %79 = vector.broadcast %cst_29 : f32 to vector<8x1xf32>
    %80 = arith.addf %78, %79 : vector<8x1xf32>
    %81 = arith.subf %23, %21 : vector<1x256xf32>
    %82 = arith.subf %24, %22 : vector<1x256xf32>
    %cst_30 = arith.constant 1.000000e-07 : f32
    %83 = vector.broadcast %cst_30 : f32 to vector<1x256xf32>
    %84 = arith.addf %82, %83 : vector<1x256xf32>
    %85 = vector.broadcast %19 : vector<8x1xf32> to vector<8x256xf32>
    %86 = vector.broadcast %23 : vector<1x256xf32> to vector<8x256xf32>
    %87 = arith.minimumf %85, %86 : vector<8x256xf32>
    %88 = vector.broadcast %17 : vector<8x1xf32> to vector<8x256xf32>
    %89 = vector.broadcast %21 : vector<1x256xf32> to vector<8x256xf32>
    %90 = arith.maximumf %88, %89 : vector<8x256xf32>
    %91 = arith.subf %87, %90 : vector<8x256xf32>
    %cst_31 = arith.constant 0.000000e+00 : f32
    %92 = vector.broadcast %cst_31 : f32 to vector<8x256xf32>
    %93 = arith.maximumf %91, %92 : vector<8x256xf32>
    %94 = vector.broadcast %20 : vector<8x1xf32> to vector<8x256xf32>
    %95 = vector.broadcast %24 : vector<1x256xf32> to vector<8x256xf32>
    %96 = arith.minimumf %94, %95 : vector<8x256xf32>
    %97 = vector.broadcast %18 : vector<8x1xf32> to vector<8x256xf32>
    %98 = vector.broadcast %22 : vector<1x256xf32> to vector<8x256xf32>
    %99 = arith.maximumf %97, %98 : vector<8x256xf32>
    %100 = arith.subf %96, %99 : vector<8x256xf32>
    %cst_32 = arith.constant 0.000000e+00 : f32
    %101 = vector.broadcast %cst_32 : f32 to vector<8x256xf32>
    %102 = arith.maximumf %100, %101 : vector<8x256xf32>
    %103 = arith.mulf %93, %102 : vector<8x256xf32>
    %104 = arith.mulf %77, %80 : vector<8x1xf32>
    %105 = arith.mulf %81, %84 : vector<1x256xf32>
    %106 = vector.broadcast %104 : vector<8x1xf32> to vector<8x256xf32>
    %107 = vector.broadcast %105 : vector<1x256xf32> to vector<8x256xf32>
    %108 = arith.addf %106, %107 : vector<8x256xf32>
    %109 = arith.subf %108, %103 : vector<8x256xf32>
    %cst_33 = arith.constant 1.000000e-07 : f32
    %110 = vector.broadcast %cst_33 : f32 to vector<8x256xf32>
    %111 = arith.addf %109, %110 : vector<8x256xf32>
    %112 = arith.divf %103, %111 : vector<8x256xf32>
    %113 = vector.broadcast %19 : vector<8x1xf32> to vector<8x256xf32>
    %114 = vector.broadcast %23 : vector<1x256xf32> to vector<8x256xf32>
    %115 = arith.maximumf %113, %114 : vector<8x256xf32>
    %116 = vector.broadcast %17 : vector<8x1xf32> to vector<8x256xf32>
    %117 = vector.broadcast %21 : vector<1x256xf32> to vector<8x256xf32>
    %118 = arith.minimumf %116, %117 : vector<8x256xf32>
    %119 = arith.subf %115, %118 : vector<8x256xf32>
    %120 = vector.broadcast %20 : vector<8x1xf32> to vector<8x256xf32>
    %121 = vector.broadcast %24 : vector<1x256xf32> to vector<8x256xf32>
    %122 = arith.maximumf %120, %121 : vector<8x256xf32>
    %123 = vector.broadcast %18 : vector<8x1xf32> to vector<8x256xf32>
    %124 = vector.broadcast %22 : vector<1x256xf32> to vector<8x256xf32>
    %125 = arith.minimumf %123, %124 : vector<8x256xf32>
    %126 = arith.subf %122, %125 : vector<8x256xf32>
    %127 = arith.mulf %119, %119 : vector<8x256xf32>
    %128 = arith.mulf %126, %126 : vector<8x256xf32>
    %129 = arith.addf %127, %128 : vector<8x256xf32>
    %cst_34 = arith.constant 1.000000e-07 : f32
    %130 = vector.broadcast %cst_34 : f32 to vector<8x256xf32>
    %131 = arith.addf %129, %130 : vector<8x256xf32>
    %132 = arith.addf %21, %23 : vector<1x256xf32>
    %133 = vector.broadcast %132 : vector<1x256xf32> to vector<8x256xf32>
    %134 = vector.broadcast %17 : vector<8x1xf32> to vector<8x256xf32>
    %135 = arith.subf %133, %134 : vector<8x256xf32>
    %136 = vector.broadcast %19 : vector<8x1xf32> to vector<8x256xf32>
    %137 = arith.subf %135, %136 : vector<8x256xf32>
    %138 = arith.addf %22, %24 : vector<1x256xf32>
    %139 = vector.broadcast %138 : vector<1x256xf32> to vector<8x256xf32>
    %140 = vector.broadcast %18 : vector<8x1xf32> to vector<8x256xf32>
    %141 = arith.subf %139, %140 : vector<8x256xf32>
    %142 = vector.broadcast %20 : vector<8x1xf32> to vector<8x256xf32>
    %143 = arith.subf %141, %142 : vector<8x256xf32>
    %144 = arith.mulf %137, %137 : vector<8x256xf32>
    %145 = arith.mulf %143, %143 : vector<8x256xf32>
    %146 = arith.addf %144, %145 : vector<8x256xf32>
    %cst_35 = arith.constant 2.500000e-01 : f32
    %147 = vector.broadcast %cst_35 : f32 to vector<8x256xf32>
    %148 = arith.mulf %146, %147 : vector<8x256xf32>
    %149 = vector.broadcast %14 : vector<1x256xf32> to vector<8x256xf32>
    %150 = vector.broadcast %12 : vector<8x1xf32> to vector<8x256xf32>
    %151 = arith.subf %149, %150 : vector<8x256xf32>
    %152 = arith.mulf %151, %151 : vector<8x256xf32>
    %cst_36 = arith.constant 0.405284733 : f32
    %153 = vector.broadcast %cst_36 : f32 to vector<8x256xf32>
    %154 = arith.mulf %153, %152 : vector<8x256xf32>
    %155 = arith.subf %154, %112 : vector<8x256xf32>
    %cst_37 = arith.constant 1.00000012 : f32
    %156 = vector.broadcast %cst_37 : f32 to vector<8x256xf32>
    %157 = arith.addf %155, %156 : vector<8x256xf32>
    %158 = arith.divf %154, %157 : vector<8x256xf32>
    %159 = arith.divf %148, %131 : vector<8x256xf32>
    %160 = arith.mulf %154, %158 : vector<8x256xf32>
    %161 = arith.addf %159, %160 : vector<8x256xf32>
    %162 = arith.subf %112, %161 : vector<8x256xf32>
    %cst_38 = arith.constant 0.000000e+00 : f32
    %163 = vector.broadcast %cst_38 : f32 to vector<8x256xf32>
    %164 = arith.maximumf %162, %163 : vector<8x256xf32>
    %165 = arith.mulf %164, %52 : vector<8x256xf32>
    %166 = arith.mulf %165, %165 : vector<8x256xf32>
    %167 = arith.mulf %166, %166 : vector<8x256xf32>
    %168 = arith.mulf %166, %167 : vector<8x256xf32>
    %169 = arith.mulf %76, %168 : vector<8x256xf32>
    %170 = arith.mulf %169, %52 : vector<8x256xf32>
    %171 = tpu.iota {dimensions = array<i32: 1>} : vector<8x256xi32>
    %c255_i32 = arith.constant 255 : i32
    %172 = vector.broadcast %c255_i32 : i32 to vector<8x256xi32>
    %173 = arith.subi %172, %171 : vector<8x256xi32>
    %cst_39 = arith.constant -1.000000e+00 : f32
    %174 = vector.shape_cast %27 : vector<1x256xi1> to vector<1x256xi1>
    %175 = vector.broadcast %174 : vector<1x256xi1> to vector<8x256xi1>
    %176 = vector.broadcast %cst_39 : f32 to vector<8x256xf32>
    %177 = arith.select %175, %170, %176 : vector<8x256xi1>, vector<8x256xf32>
    %178 = tpu.bitcast %177 : vector<8x256xf32> -> vector<8x256xi32>
    %c-256_i32 = arith.constant -256 : i32
    %179 = vector.broadcast %c-256_i32 : i32 to vector<8x256xi32>
    %180 = arith.andi %178, %179 : vector<8x256xi32>
    %181 = arith.ori %180, %173 : vector<8x256xi32>
    %cst_40 = arith.constant 0.000000e+00 : f32
    %182 = vector.broadcast %cst_40 : f32 to vector<8x256xf32>
    %cst_41 = arith.constant dense<-2147483648> : vector<8xi32>
    %183 = vector.multi_reduction <maxsi>, %181, %cst_41 [1] : vector<8x256xi32> to vector<8xi32>
    %184 = vector.shape_cast %183 : vector<8xi32> to vector<8x1xi32>
    %185 = vector.broadcast %184 : vector<8x1xi32> to vector<8x256xi32>
    %186 = arith.cmpi eq, %181, %185 : vector<8x256xi32>
    %187 = arith.extui %186 : vector<8x256xi1> to vector<8x256xi32>
    %188 = arith.sitofp %187 : vector<8x256xi32> to vector<8x256xf32>
    %189 = arith.addf %182, %188 : vector<8x256xf32>
    %c-2147483648_i32 = arith.constant -2147483648 : i32
    %190 = vector.broadcast %c-2147483648_i32 : i32 to vector<8x256xi32>
    %191 = arith.select %186, %190, %181 : vector<8x256xi1>, vector<8x256xi32>
    %cst_42 = arith.constant dense<-2147483648> : vector<8xi32>
    %192 = vector.multi_reduction <maxsi>, %191, %cst_42 [1] : vector<8x256xi32> to vector<8xi32>
    %193 = vector.shape_cast %192 : vector<8xi32> to vector<8x1xi32>
    %194 = vector.broadcast %193 : vector<8x1xi32> to vector<8x256xi32>
    %195 = arith.cmpi eq, %191, %194 : vector<8x256xi32>
    %196 = arith.extui %195 : vector<8x256xi1> to vector<8x256xi32>
    %197 = arith.sitofp %196 : vector<8x256xi32> to vector<8x256xf32>
    %198 = arith.addf %189, %197 : vector<8x256xf32>
    %c-2147483648_i32_43 = arith.constant -2147483648 : i32
    %199 = vector.broadcast %c-2147483648_i32_43 : i32 to vector<8x256xi32>
    %200 = arith.select %195, %199, %191 : vector<8x256xi1>, vector<8x256xi32>
    %cst_44 = arith.constant dense<-2147483648> : vector<8xi32>
    %201 = vector.multi_reduction <maxsi>, %200, %cst_44 [1] : vector<8x256xi32> to vector<8xi32>
    %202 = vector.shape_cast %201 : vector<8xi32> to vector<8x1xi32>
    %203 = vector.broadcast %202 : vector<8x1xi32> to vector<8x256xi32>
    %204 = arith.cmpi eq, %200, %203 : vector<8x256xi32>
    %205 = arith.extui %204 : vector<8x256xi1> to vector<8x256xi32>
    %206 = arith.sitofp %205 : vector<8x256xi32> to vector<8x256xf32>
    %207 = arith.addf %198, %206 : vector<8x256xf32>
    %c-2147483648_i32_45 = arith.constant -2147483648 : i32
    %208 = vector.broadcast %c-2147483648_i32_45 : i32 to vector<8x256xi32>
    %209 = arith.select %204, %208, %200 : vector<8x256xi1>, vector<8x256xi32>
    %cst_46 = arith.constant dense<-2147483648> : vector<8xi32>
    %210 = vector.multi_reduction <maxsi>, %209, %cst_46 [1] : vector<8x256xi32> to vector<8xi32>
    %211 = vector.shape_cast %210 : vector<8xi32> to vector<8x1xi32>
    %212 = vector.broadcast %211 : vector<8x1xi32> to vector<8x256xi32>
    %213 = arith.cmpi eq, %209, %212 : vector<8x256xi32>
    %214 = arith.extui %213 : vector<8x256xi1> to vector<8x256xi32>
    %215 = arith.sitofp %214 : vector<8x256xi32> to vector<8x256xf32>
    %216 = arith.addf %207, %215 : vector<8x256xf32>
    %c-2147483648_i32_47 = arith.constant -2147483648 : i32
    %217 = vector.broadcast %c-2147483648_i32_47 : i32 to vector<8x256xi32>
    %218 = arith.select %213, %217, %209 : vector<8x256xi1>, vector<8x256xi32>
    %cst_48 = arith.constant dense<-2147483648> : vector<8xi32>
    %219 = vector.multi_reduction <maxsi>, %218, %cst_48 [1] : vector<8x256xi32> to vector<8xi32>
    %220 = vector.shape_cast %219 : vector<8xi32> to vector<8x1xi32>
    %221 = vector.broadcast %220 : vector<8x1xi32> to vector<8x256xi32>
    %222 = arith.cmpi eq, %218, %221 : vector<8x256xi32>
    %223 = arith.extui %222 : vector<8x256xi1> to vector<8x256xi32>
    %224 = arith.sitofp %223 : vector<8x256xi32> to vector<8x256xf32>
    %225 = arith.addf %216, %224 : vector<8x256xf32>
    %c-2147483648_i32_49 = arith.constant -2147483648 : i32
    %226 = vector.broadcast %c-2147483648_i32_49 : i32 to vector<8x256xi32>
    %227 = arith.select %222, %226, %218 : vector<8x256xi1>, vector<8x256xi32>
    %cst_50 = arith.constant dense<-2147483648> : vector<8xi32>
    %228 = vector.multi_reduction <maxsi>, %227, %cst_50 [1] : vector<8x256xi32> to vector<8xi32>
    %229 = vector.shape_cast %228 : vector<8xi32> to vector<8x1xi32>
    %230 = vector.broadcast %229 : vector<8x1xi32> to vector<8x256xi32>
    %231 = arith.cmpi eq, %227, %230 : vector<8x256xi32>
    %232 = arith.extui %231 : vector<8x256xi1> to vector<8x256xi32>
    %233 = arith.sitofp %232 : vector<8x256xi32> to vector<8x256xf32>
    %234 = arith.addf %225, %233 : vector<8x256xf32>
    %c-2147483648_i32_51 = arith.constant -2147483648 : i32
    %235 = vector.broadcast %c-2147483648_i32_51 : i32 to vector<8x256xi32>
    %236 = arith.select %231, %235, %227 : vector<8x256xi1>, vector<8x256xi32>
    %cst_52 = arith.constant dense<-2147483648> : vector<8xi32>
    %237 = vector.multi_reduction <maxsi>, %236, %cst_52 [1] : vector<8x256xi32> to vector<8xi32>
    %238 = vector.shape_cast %237 : vector<8xi32> to vector<8x1xi32>
    %239 = vector.broadcast %238 : vector<8x1xi32> to vector<8x256xi32>
    %240 = arith.cmpi eq, %236, %239 : vector<8x256xi32>
    %241 = arith.extui %240 : vector<8x256xi1> to vector<8x256xi32>
    %242 = arith.sitofp %241 : vector<8x256xi32> to vector<8x256xf32>
    %243 = arith.addf %234, %242 : vector<8x256xf32>
    %c-2147483648_i32_53 = arith.constant -2147483648 : i32
    %244 = vector.broadcast %c-2147483648_i32_53 : i32 to vector<8x256xi32>
    %245 = arith.select %240, %244, %236 : vector<8x256xi1>, vector<8x256xi32>
    %cst_54 = arith.constant dense<-2147483648> : vector<8xi32>
    %246 = vector.multi_reduction <maxsi>, %245, %cst_54 [1] : vector<8x256xi32> to vector<8xi32>
    %247 = vector.shape_cast %246 : vector<8xi32> to vector<8x1xi32>
    %248 = vector.broadcast %247 : vector<8x1xi32> to vector<8x256xi32>
    %249 = arith.cmpi eq, %245, %248 : vector<8x256xi32>
    %250 = arith.extui %249 : vector<8x256xi1> to vector<8x256xi32>
    %251 = arith.sitofp %250 : vector<8x256xi32> to vector<8x256xf32>
    %252 = arith.addf %243, %251 : vector<8x256xf32>
    %c-2147483648_i32_55 = arith.constant -2147483648 : i32
    %253 = vector.broadcast %c-2147483648_i32_55 : i32 to vector<8x256xi32>
    %254 = arith.select %249, %253, %245 : vector<8x256xi1>, vector<8x256xi32>
    %cst_56 = arith.constant dense<-2147483648> : vector<8xi32>
    %255 = vector.multi_reduction <maxsi>, %254, %cst_56 [1] : vector<8x256xi32> to vector<8xi32>
    %256 = vector.shape_cast %255 : vector<8xi32> to vector<8x1xi32>
    %257 = vector.broadcast %256 : vector<8x1xi32> to vector<8x256xi32>
    %258 = arith.cmpi eq, %254, %257 : vector<8x256xi32>
    %259 = arith.extui %258 : vector<8x256xi1> to vector<8x256xi32>
    %260 = arith.sitofp %259 : vector<8x256xi32> to vector<8x256xf32>
    %261 = arith.addf %252, %260 : vector<8x256xf32>
    %c-2147483648_i32_57 = arith.constant -2147483648 : i32
    %262 = vector.broadcast %c-2147483648_i32_57 : i32 to vector<8x256xi32>
    %263 = arith.select %258, %262, %254 : vector<8x256xi1>, vector<8x256xi32>
    %cst_58 = arith.constant dense<-2147483648> : vector<8xi32>
    %264 = vector.multi_reduction <maxsi>, %263, %cst_58 [1] : vector<8x256xi32> to vector<8xi32>
    %265 = vector.shape_cast %264 : vector<8xi32> to vector<8x1xi32>
    %266 = vector.broadcast %265 : vector<8x1xi32> to vector<8x256xi32>
    %267 = arith.cmpi eq, %263, %266 : vector<8x256xi32>
    %268 = arith.extui %267 : vector<8x256xi1> to vector<8x256xi32>
    %269 = arith.sitofp %268 : vector<8x256xi32> to vector<8x256xf32>
    %270 = arith.addf %261, %269 : vector<8x256xf32>
    %c-2147483648_i32_59 = arith.constant -2147483648 : i32
    %271 = vector.broadcast %c-2147483648_i32_59 : i32 to vector<8x256xi32>
    %272 = arith.select %267, %271, %263 : vector<8x256xi1>, vector<8x256xi32>
    %cst_60 = arith.constant dense<-2147483648> : vector<8xi32>
    %273 = vector.multi_reduction <maxsi>, %272, %cst_60 [1] : vector<8x256xi32> to vector<8xi32>
    %274 = vector.shape_cast %273 : vector<8xi32> to vector<8x1xi32>
    %275 = vector.broadcast %274 : vector<8x1xi32> to vector<8x256xi32>
    %276 = arith.cmpi eq, %272, %275 : vector<8x256xi32>
    %277 = arith.extui %276 : vector<8x256xi1> to vector<8x256xi32>
    %278 = arith.sitofp %277 : vector<8x256xi32> to vector<8x256xf32>
    %279 = arith.addf %270, %278 : vector<8x256xf32>
    %c-2147483648_i32_61 = arith.constant -2147483648 : i32
    %280 = vector.broadcast %c-2147483648_i32_61 : i32 to vector<8x256xi32>
    %281 = arith.select %276, %280, %272 : vector<8x256xi1>, vector<8x256xi32>
    %cst_62 = arith.constant dense<-2147483648> : vector<8xi32>
    %282 = vector.multi_reduction <maxsi>, %281, %cst_62 [1] : vector<8x256xi32> to vector<8xi32>
    %283 = vector.shape_cast %282 : vector<8xi32> to vector<8x1xi32>
    %284 = vector.broadcast %283 : vector<8x1xi32> to vector<8x256xi32>
    %285 = arith.cmpi eq, %281, %284 : vector<8x256xi32>
    %286 = arith.extui %285 : vector<8x256xi1> to vector<8x256xi32>
    %287 = arith.sitofp %286 : vector<8x256xi32> to vector<8x256xf32>
    %288 = arith.addf %279, %287 : vector<8x256xf32>
    %c-2147483648_i32_63 = arith.constant -2147483648 : i32
    %289 = vector.broadcast %c-2147483648_i32_63 : i32 to vector<8x256xi32>
    %290 = arith.select %285, %289, %281 : vector<8x256xi1>, vector<8x256xi32>
    %cst_64 = arith.constant dense<-2147483648> : vector<8xi32>
    %291 = vector.multi_reduction <maxsi>, %290, %cst_64 [1] : vector<8x256xi32> to vector<8xi32>
    %292 = vector.shape_cast %291 : vector<8xi32> to vector<8x1xi32>
    %293 = vector.broadcast %292 : vector<8x1xi32> to vector<8x256xi32>
    %294 = arith.cmpi eq, %290, %293 : vector<8x256xi32>
    %295 = arith.extui %294 : vector<8x256xi1> to vector<8x256xi32>
    %296 = arith.sitofp %295 : vector<8x256xi32> to vector<8x256xf32>
    %297 = arith.addf %288, %296 : vector<8x256xf32>
    %298 = arith.mulf %297, %52 : vector<8x256xf32>
    %299 = tpu.iota {dimensions = array<i32: 0>} : vector<8x256xi32>
    %c7_i32 = arith.constant 7 : i32
    %300 = vector.broadcast %c7_i32 : i32 to vector<8x256xi32>
    %301 = arith.subi %300, %299 : vector<8x256xi32>
    %cst_65 = arith.constant dense<0.000000e+00> : vector<256xf32>
    %302 = vector.multi_reduction <add>, %298, %cst_65 [0] : vector<8x256xf32> to vector<256xf32>
    %303 = vector.shape_cast %302 : vector<256xf32> to vector<1x256xf32>
    %cst_66 = arith.constant 1.000000e+00 : f32
    %304 = vector.broadcast %cst_66 : f32 to vector<1x256xf32>
    %305 = arith.cmpf ogt, %303, %304 : vector<1x256xf32>
    %306 = tpu.bitcast %165 : vector<8x256xf32> -> vector<8x256xi32>
    %c-8_i32 = arith.constant -8 : i32
    %307 = vector.broadcast %c-8_i32 : i32 to vector<8x256xi32>
    %308 = arith.andi %306, %307 : vector<8x256xi32>
    %309 = arith.ori %308, %301 : vector<8x256xi32>
    %cst_67 = arith.constant dense<-2147483648> : vector<256xi32>
    %310 = vector.multi_reduction <maxsi>, %309, %cst_67 [0] : vector<8x256xi32> to vector<256xi32>
    %311 = vector.shape_cast %310 : vector<256xi32> to vector<1x256xi32>
    %312 = vector.broadcast %311 : vector<1x256xi32> to vector<8x256xi32>
    %313 = arith.cmpi eq, %309, %312 : vector<8x256xi32>
    %314 = arith.extui %313 : vector<8x256xi1> to vector<8x256xi32>
    %315 = arith.sitofp %314 : vector<8x256xi32> to vector<8x256xf32>
    %316 = vector.shape_cast %305 : vector<1x256xi1> to vector<1x256xi1>
    %317 = vector.broadcast %316 : vector<1x256xi1> to vector<8x256xi1>
    %318 = arith.select %317, %315, %298 : vector<8x256xi1>, vector<8x256xf32>
    %cst_68 = arith.constant 1.000000e+00 : f32
    %319 = vector.broadcast %cst_68 : f32 to vector<1x256xf32>
    %320 = arith.select %305, %319, %303 : vector<1x256xi1>, vector<1x256xf32>
    %321 = arith.fptosi %318 : vector<8x256xf32> to vector<8x256xi32>
    %c8_i32 = arith.constant 8 : i32
    %322 = vector.broadcast %c8_i32 : i32 to vector<8x256xi32>
    %323 = arith.muli %321, %322 : vector<8x256xi32>
    %324 = arith.addi %323, %301 : vector<8x256xi32>
    %cst_69 = arith.constant dense<-2147483648> : vector<256xi32>
    %325 = vector.multi_reduction <maxsi>, %324, %cst_69 [0] : vector<8x256xi32> to vector<256xi32>
    %326 = vector.shape_cast %325 : vector<256xi32> to vector<1x256xi32>
    %c7_i32_70 = arith.constant 7 : i32
    %327 = vector.broadcast %c7_i32_70 : i32 to vector<1x256xi32>
    %328 = arith.andi %326, %327 : vector<1x256xi32>
    %c7_i32_71 = arith.constant 7 : i32
    %329 = vector.broadcast %c7_i32_71 : i32 to vector<1x256xi32>
    %330 = arith.subi %329, %328 : vector<1x256xi32>
    %331 = vector.broadcast %326 : vector<1x256xi32> to vector<8x256xi32>
    %332 = arith.cmpi eq, %324, %331 : vector<8x256xi32>
    %333 = arith.extui %332 : vector<8x256xi1> to vector<8x256xi32>
    %334 = arith.sitofp %333 : vector<8x256xi32> to vector<8x256xf32>
    %335 = arith.sitofp %6 : vector<8x1xi32> to vector<8x1xf32>
    %336 = tpu.concatenate %8, %335 in 1 : vector<8x4xf32>, vector<8x1xf32> -> vector<8x5xf32>
    %cst_72 = arith.constant dense<0.000000e+00> : vector<5x256xf32>
    %337 = tpu.matmul %336, %334, %cst_72 {dimension_numbers = #tpu.dot_dimension_numbers<[0], [0], [1], [1], [0, 1, 1, 1], [], []>} : vector<8x5xf32>, vector<8x256xf32>, vector<5x256xf32> -> vector<5x256xf32>
    %338 = vector.extract_strided_slice %337 {offsets = [0, 0], sizes = [4, 256], strides = [1, 1]} : vector<5x256xf32> to vector<4x256xf32>
    %c0_73 = arith.constant 0 : index
    %c0_74 = arith.constant 0 : index
    %c0_75 = arith.constant 0 : index
    %339 = vector.load %arg10[%c0_73, %c0_74, %c0_75] : memref<1x4x256xf32, #tpu.memory_space<vmem>>, vector<1x4x256xf32>
    %340 = vector.shape_cast %339 : vector<1x4x256xf32> to vector<4x256xf32>
    %341 = vector.shape_cast %338 : vector<4x256xf32> to vector<1x4x256xf32>
    tpu.vector_store %arg10[%c0_73, %c0_74, %c0_75], %341 {strides = array<i32>} : memref<1x4x256xf32, #tpu.memory_space<vmem>>, vector<1x4x256xf32>,
    %342 = vector.extract_strided_slice %337 {offsets = [4, 0], sizes = [1, 256], strides = [1, 1]} : vector<5x256xf32> to vector<1x256xf32>
    %343 = arith.fptosi %342 : vector<1x256xf32> to vector<1x256xi32>
    %c0_i32 = arith.constant 0 : i32
    %344 = vector.broadcast %c0_i32 : i32 to vector<1x256xi32>
    %345 = arith.maxsi %343, %344 : vector<1x256xi32>
    %346 = arith.mulf %170, %318 : vector<8x256xf32>
    %cst_76 = arith.constant dense<0xFF800000> : vector<8xf32>
    %347 = vector.multi_reduction <maximumf>, %346, %cst_76 [1] : vector<8x256xf32> to vector<8xf32>
    %348 = vector.shape_cast %347 : vector<8xf32> to vector<8x1xf32>
    %349 = arith.mulf %165, %318 : vector<8x256xf32>
    %cst_77 = arith.constant dense<0xFF800000> : vector<8xf32>
    %350 = vector.multi_reduction <maximumf>, %349, %cst_77 [1] : vector<8x256xf32> to vector<8xf32>
    %351 = vector.shape_cast %350 : vector<8xf32> to vector<8x1xf32>
    %cst_78 = arith.constant 9.99999971E-10 : f32
    %352 = vector.broadcast %cst_78 : f32 to vector<8x1xf32>
    %353 = arith.addf %348, %352 : vector<8x1xf32>
    %354 = arith.divf %351, %353 : vector<8x1xf32>
    %355 = vector.broadcast %354 : vector<8x1xf32> to vector<8x256xf32>
    %356 = arith.mulf %346, %355 : vector<8x256xf32>
    %cst_79 = arith.constant dense<0xFF800000> : vector<256xf32>
    %357 = vector.multi_reduction <maximumf>, %356, %cst_79 [0] : vector<8x256xf32> to vector<256xf32>
    %358 = vector.shape_cast %357 : vector<256xf32> to vector<1x256xf32>
    %359 = tpu.iota {dimensions = array<i32: 0>} : vector<80x256xi32>
    %360 = vector.broadcast %345 : vector<1x256xi32> to vector<80x256xi32>
    %361 = arith.cmpi eq, %359, %360 : vector<80x256xi32>
    %cst_80 = arith.constant 0.000000e+00 : f32
    %362 = vector.broadcast %cst_80 : f32 to vector<1x256xf32>
    %363 = arith.cmpf ogt, %320, %362 : vector<1x256xf32>
    %364 = vector.broadcast %363 : vector<1x256xi1> to vector<80x256xi1>
    %365 = arith.andi %361, %364 : vector<80x256xi1>
    %cst_81 = arith.constant 0.000000e+00 : f32
    %366 = vector.shape_cast %358 : vector<1x256xf32> to vector<1x256xf32>
    %367 = vector.broadcast %366 : vector<1x256xf32> to vector<80x256xf32>
    %368 = vector.broadcast %cst_81 : f32 to vector<80x256xf32>
    %369 = arith.select %365, %367, %368 : vector<80x256xi1>, vector<80x256xf32>
    %c0_82 = arith.constant 0 : index
    %c0_83 = arith.constant 0 : index
    %c0_84 = arith.constant 0 : index
    %370 = vector.load %arg11[%c0_82, %c0_83, %c0_84] : memref<1x80x256xf32, #tpu.memory_space<vmem>>, vector<1x80x256xf32>
    %371 = vector.shape_cast %370 : vector<1x80x256xf32> to vector<80x256xf32>
    %372 = vector.shape_cast %369 : vector<80x256xf32> to vector<1x80x256xf32>
    tpu.vector_store %arg11[%c0_82, %c0_83, %c0_84], %372 {strides = array<i32>} : memref<1x80x256xf32, #tpu.memory_space<vmem>>, vector<1x80x256xf32>,
    %c0_85 = arith.constant 0 : index
    %c0_86 = arith.constant 0 : index
    %c0_87 = arith.constant 0 : index
    %373 = vector.load %arg9[%c0_85, %c0_86, %c0_87] : memref<1x1x256xi32, #tpu.memory_space<vmem>>, vector<1x1x256xi32>
    %374 = vector.shape_cast %373 : vector<1x1x256xi32> to vector<1x256xi32>
    %375 = vector.shape_cast %345 : vector<1x256xi32> to vector<1x1x256xi32>
    tpu.vector_store %arg9[%c0_85, %c0_86, %c0_87], %375 {strides = array<i32>} : memref<1x1x256xi32, #tpu.memory_space<vmem>>, vector<1x1x256xi32>,
    %c0_88 = arith.constant 0 : index
    %c0_89 = arith.constant 0 : index
    %c0_90 = arith.constant 0 : index
    %376 = vector.load %arg12[%c0_88, %c0_89, %c0_90] : memref<1x1x256xf32, #tpu.memory_space<vmem>>, vector<1x1x256xf32>
    %377 = vector.shape_cast %376 : vector<1x1x256xf32> to vector<1x256xf32>
    %378 = vector.shape_cast %320 : vector<1x256xf32> to vector<1x1x256xf32>
    tpu.vector_store %arg12[%c0_88, %c0_89, %c0_90], %378 {strides = array<i32>} : memref<1x1x256xf32, #tpu.memory_space<vmem>>, vector<1x1x256xf32>,
    %c0_91 = arith.constant 0 : index
    %c0_92 = arith.constant 0 : index
    %c0_93 = arith.constant 0 : index
    %379 = vector.load %arg13[%c0_91, %c0_92, %c0_93] : memref<1x1x256xi32, #tpu.memory_space<vmem>>, vector<1x1x256xi32>
    %380 = vector.shape_cast %379 : vector<1x1x256xi32> to vector<1x256xi32>
    %381 = vector.shape_cast %330 : vector<1x256xi32> to vector<1x1x256xi32>
    tpu.vector_store %arg13[%c0_91, %c0_92, %c0_93], %381 {strides = array<i32>} : memref<1x1x256xi32, #tpu.memory_space<vmem>>, vector<1x1x256xi32>,
    return
  }
  func.func @transform_0(%arg0: i32) -> (i32, i32, i32) {
    %c0_i32 = arith.constant 0 : i32
    %c0_i32_0 = arith.constant 0 : i32
    %c0_i32_1 = arith.constant 0 : i32
    return %arg0, %c0_i32, %c0_i32_0 : i32, i32, i32
  }
  func.func @transform_1(%arg0: i32) -> (i32, i32, i32) {
    %c0_i32 = arith.constant 0 : i32
    %c0_i32_0 = arith.constant 0 : i32
    %c0_i32_1 = arith.constant 0 : i32
    return %arg0, %c0_i32, %c0_i32_0 : i32, i32, i32
  }
  func.func @transform_2(%arg0: i32) -> (i32, i32) {
    %c0_i32 = arith.constant 0 : i32
    %c0_i32_0 = arith.constant 0 : i32
    %c0_i32_1 = arith.constant 0 : i32
    return %c0_i32, %c0_i32_0 : i32, i32
  }
  func.func @transform_3(%arg0: i32) -> (i32, i32, i32) {
    %c0_i32 = arith.constant 0 : i32
    %c0_i32_0 = arith.constant 0 : i32
    %c0_i32_1 = arith.constant 0 : i32
    return %arg0, %c0_i32, %c0_i32_0 : i32, i32, i32
  }
  func.func @transform_4(%arg0: i32) -> (i32, i32, i32) {
    %c0_i32 = arith.constant 0 : i32
    %c0_i32_0 = arith.constant 0 : i32
    %c0_i32_1 = arith.constant 0 : i32
    return %arg0, %c0_i32, %c0_i32_0 : i32, i32, i32
  }
  func.func @transform_5(%arg0: i32) -> (i32, i32, i32) {
    %c0_i32 = arith.constant 0 : i32
    %c0_i32_0 = arith.constant 0 : i32
    %c0_i32_1 = arith.constant 0 : i32
    return %arg0, %c0_i32, %c0_i32_0 : i32, i32, i32
  }
  func.func @transform_6(%arg0: i32) -> (i32, i32, i32) {
    %c0_i32 = arith.constant 0 : i32
    %c0_i32_0 = arith.constant 0 : i32
    %c0_i32_1 = arith.constant 0 : i32
    return %arg0, %c0_i32, %c0_i32_0 : i32, i32, i32
  }
  func.func @transform_7(%arg0: i32) -> (i32, i32, i32) {
    %c0_i32 = arith.constant 0 : i32
    %c0_i32_0 = arith.constant 0 : i32
    %c0_i32_1 = arith.constant 0 : i32
    return %arg0, %c0_i32, %c0_i32_0 : i32, i32, i32
  }
  func.func @transform_8(%arg0: i32) -> (i32, i32, i32) {
    %c0_i32 = arith.constant 0 : i32
    %c0_i32_0 = arith.constant 0 : i32
    %c0_i32_1 = arith.constant 0 : i32
    return %arg0, %c0_i32, %c0_i32_0 : i32, i32, i32
  }
  func.func @transform_9(%arg0: i32) -> (i32, i32, i32) {
    %c0_i32 = arith.constant 0 : i32
    %c0_i32_0 = arith.constant 0 : i32
    %c0_i32_1 = arith.constant 0 : i32
    return %arg0, %c0_i32, %c0_i32_0 : i32, i32, i32
  }
  func.func @transform_10(%arg0: i32) -> (i32, i32, i32) {
    %c0_i32 = arith.constant 0 : i32
    %c0_i32_0 = arith.constant 0 : i32
    %c0_i32_1 = arith.constant 0 : i32
    return %arg0, %c0_i32, %c0_i32_0 : i32, i32, i32
  }
  func.func @transform_11(%arg0: i32) -> (i32, i32, i32) {
    %c0_i32 = arith.constant 0 : i32
    %c0_i32_0 = arith.constant 0 : i32
    %c0_i32_1 = arith.constant 0 : i32
    return %arg0, %c0_i32, %c0_i32_0 : i32, i32, i32
  }
  func.func @transform_12(%arg0: i32) -> (i32, i32, i32) {
    %c0_i32 = arith.constant 0 : i32
    %c0_i32_0 = arith.constant 0 : i32
    %c0_i32_1 = arith.constant 0 : i32
    return %arg0, %c0_i32, %c0_i32_0 : i32, i32, i32
  }
}

</mosaic_0001>

<bundles_post_ra>
// kernel: tpu_custom_call.1
= control target key start
LH: loop header
LB: loop body
LE: loop exit
PB: predicated region body
PF: predicated region fallthrough
CT: control target
= control target key end

     0   :  { %s3894_s0 = inlined_call_operand.hbm [shape: f32[2,80,256], index: 0, kind: input, shape index: {}]   ;;  %s3895_s1 = inlined_call_operand.vmem [shape: f32[2,4,256], index: 1, kind: input, shape index: {}]   ;;  %s3896_s2 = inlined_call_operand.vmem [shape: f32[2,256], index: 2, kind: input, shape index: {}]   ;;  %s3897_s3 = inlined_call_operand.vmem [shape: s32[2,8,1], index: 3, kind: input, shape index: {}]   ;;  %s3898_s4 = inlined_call_operand.vmem [shape: f32[2,8,4], index: 4, kind: input, shape index: {}]   ;;  %s3899_s5 = inlined_call_operand.vmem [shape: f32[2,8,1], index: 5, kind: input, shape index: {}]   ;;  %s3900_s6 = inlined_call_operand.vmem [shape: f32[2,8,1], index: 6, kind: input, shape index: {}]   ;;  %s3901_s7 = inlined_call_operand.vmem [shape: f32[2,1,256], index: 7, kind: input, shape index: {}]   ;;  %s3902_s8 = inlined_call_operand.hbm [shape: s32[2,1,256], index: 8, kind: output, shape index: {0}]   ;;  %s3903_s9 = inlined_call_operand.hbm [shape: f32[2,4,256], index: 9, kind: output, shape index: {1}]   ;;  %s3904_s10 = inlined_call_operand.hbm [shape: f32[2,80,256], index: 10, kind: output, shape index: {2}]   ;;  %s3905_s11 = inlined_call_operand.hbm [shape: f32[2,1,256], index: 11, kind: output, shape index: {3}]   ;;  %s3906_s12 = inlined_call_operand.hbm [shape: s32[2,1,256], index: 12, kind: output, shape index: {4}]  }
   0x1   :  { %3917 = sst [smem:[#allocation21_spill]] %s3894_s0 }
   0x2   :  { %18 = vsyncpa [#allocation3], 0 }
   0x3   :  { %20 = vsyncpa [#allocation3 + $0x1], 0 }
   0x4   :  { %21 = vsyncpa [#allocation4], 0 }
   0x5   :  { %23 = vsyncpa [#allocation4 + $0x1], 0 }
   0x6   :  { %24 = vsyncpa [#allocation7], 0 }
   0x7   :  { %26 = vsyncpa [#allocation7 + $0x1], 0 }
   0x8   :  { %27 = vsyncpa [#allocation10], 0 }
   0x9   :  { %29 = vsyncpa [#allocation10 + $0x1], 0  ;;  %s2962_s21 = smov 0   ;;  %s2964_s22 = smov 0  }
   0xa   :  { %s2966_s23 = smov 0   ;;  %s2968_s24 = smov 0  }
   0xb LB: > { %3918 = sst [smem:[#allocation16_spill]] %s2862_s21  ;;  %s2983_s25 = sadd.s32 4294967295, %s2874_s24   ;;  %s2874_s24 = sphi %s2968_s24, %s3943_s24   ;;  %s2870_s23 = sphi %s2966_s23, %s3945_s23   ;;  %s2866_s22 = sphi %s2964_s22, %s3947_s22   ;;  %s2862_s21 = sphi %s2962_s21, %s3946_s21  }
   0xc   : > { %3919 = sst [smem:[#allocation17_spill]] %s2870_s23  ;;  %s3907_s26 = sadd.s32 4294967294, %s2874_s24  }
   0xd   : > { %s2987_s27 = sadd.s32 1, %s2874_s24   ;;  %s42_s28 = sadd.s32 1, %s2870_s23 }
   0xe   : > { %3920 = sst [smem:[#allocation18_spill]] %s2987_s27  ;;  %s39_s29 = ssub.s32 %s2874_s24, %s2987_s27 }
   0xf   : > { %p49_p0 = scmp.ne.s32.totalorder %s2870_s23, %s2866_s22  ;;  %p40_p1 = scmp.eq.s32.totalorder %s39_s29, 0 }
  0x10   : > { %p50_p2 = scmp.eq.s32.totalorder %s2874_s24, 0  ;;  %p55_p3 = scmp.ne.s32.totalorder %s2866_s22, %s2862_s21 }
  0x11   : > { %p56_p4 = scmp.eq.s32.totalorder %s2983_s25, 0  ;;  %p256_p7 = scmp.eq.s32.totalorder %s2983_s25, 1 }
  0x12   : > { %s2999_s30 = scalar_select %p40_p1, %s2870_s23, %s42_s28  }
  0x13   : > { %p51_p5 = por %p50_p2, %p49_p0  ;;  %p3001_p6 = por %p56_p4, %p55_p3 }
  0x14   : > { %3921 = sst [smem:[#allocation19_spill]] %s2999_s30  ;;  %p262_p8 = scmp.eq.s32.totalorder %s3907_s26, 1 }
  0x15   : > { %p2501_p10 = scmp.lt.s32.totalorder %s2874_s24, 2  ;;  %p3010_p11 = por %p256_p7, %p49_p0 }
  0x16   : > { %p3014_p12 = por %p262_p8, %p55_p3  ;;  %s389_s16 = sand.u32 1, %s2870_s23  }
  0x17   : > { %s3923_s14 = scalar_select %p3010_p11, 1, 0 }
  0x18   : > { %s3924_s15 = scalar_select %p3014_p12, 1, 0 }
  0x19   : > { %s2458_s17 = smul.u32 2560, %s2874_s24  ;;  %s3926_s0 = sld [smem:[#allocation21_spill]] }
  0x1a   : > { %3925 = sst [smem:[#allocation20_spill]] %s3924_s15  ;;  %s2457_s18 = smul.u32 160, %s389_s16 }
  0x1b   : > { %p3025_p13 = pnand %p2501_p10, %p51_p5  ;;  %s3031_s23 = scalar_lea.sflag [#allocation3], %s389_s16 }
  0x1c   : > { %s393_s26 = scalar_lea.vmem [#allocation2], %s2457_s18 }
  0x1d   : > { %s400_s30 = sshll.u32 %s393_s26, 4  ;;  %p2660_p1 = pneg %p3025_p13  ;;  %s3029_s30 = int_to_ptr.vmem [resolvable:$true] %s400_s30 }
  0x1f   : > { %s3023_s28 = scalar_lea.hbm %s3926_s0, %s2458_s17  ;;  %s2663_s20 = scalar_lea.hbm %s3926_s0, 5120 }
  0x20   : > { %s2658_s27 = scalar_lea.hbm %s3023_s28, 2560  ;;  %p2664_p4 = scmp.lt.u32.totalorder %s3023_s28, %s3926_s0 }
  0x21   : > { %p2659_p0 = scmp.ne.s32.totalorder %s3023_s28, %s2658_s27  ;;  %p2665_p5 = scmp.lt.u32.totalorder %s2663_s20, %s2658_s27 }
  0x22   : > { %p2667_p8 = scmp.lt.u32.totalorder %s2658_s27, %s3023_s28 }
  0x23   : > { %p2661_p2 = pnand %p2660_p1, %p2659_p0  ;;  %p2666_p7 = por %p2665_p5, %p2664_p4 }
  0x25   : > { %p2662_p3 = pneg %p2661_p2  ;;  %p2668_p10 = por %p2667_p8, %p2666_p7 }
  0x27   : > { %p2669_p9 = pnand %p2668_p10, %p2662_p3 }
  0x29   : > { %2672 = shalt.err (!%p2669_p9)
}
  0x2a   : > { %s2673_s26 = scalar_lea.vmem %s3029_s30, 2560  ;;  %s2876_s16 = smov [#allocation2]  }
  0x2b   : > { %p2674_p0 = scmp.ne.s32.totalorder %s3029_s30, %s2673_s26  ;;  %s2678_s18 = sshll.u32 %s2876_s16, 4  ;;  %s2679_s18 = int_to_ptr.vmem [resolvable:$false] %s2678_s18 }
  0x2c   : > { %s2680_s21 = scalar_lea.vmem %s2679_s18, 5120  ;;  %p2681_p11 = scmp.lt.s32.totalorder %s3029_s30, %s2679_s18 }
  0x2d   : > { %p2676_p2 = pnand %p2674_p0, %p2660_p1  ;;  %p2682_p4 = scmp.lt.s32.totalorder %s2680_s21, %s2673_s26 }
  0x2f   : > { %p2677_p12 = pneg %p2676_p2  ;;  %p2683_p5 = por %p2682_p4, %p2681_p11 }
  0x31   : > { %p2684_p7 = pnand %p2683_p5, %p2677_p12 }
  0x33   : > { %2687 = shalt.err (!%p2684_p7)
}
  0x34   : > { %s2877_s27 = smov 256   ;;  %s2878_s15 = smov 16  }
  0x35   : > { %2484 = dma.hbm_to_vmem [thread:$0]  (!%p3025_p13), %s3023_s28, 2560, %s3029_s30, %s3031_s23, %s2877_s27, %s2877_s27, %s2878_s15  }
  0x36   : > { %p2386_p9 = scmp.ge.s32.totalorder %s2874_s24, 1  ;;  %p451_p1 = scmp.lt.s32.totalorder %s2874_s24, 3 }
  0x38   : > { %p452_p3 = pnand %p2386_p9, %p451_p1 }
  0x39   : > { %s3062_s17 = sand.u32 (!%p452_p3), 1, %s2866_s22  }
  0x3a   : > { %455 = sbr.rel (%p452_p3) target bundleno = 4713 (0x1269), region = 52  ;;  %s458_s20 = scalar_lea.sflag (!%p452_p3), [#allocation3], %s3062_s17 }
  0x3b   : > { %s3914_s19 = smul.u32 (!%p452_p3), 160, %s3062_s17 }
  0x3d   : > { %s3068_s26 = scalar_lea.vmem (!%p452_p3), [#allocation2], %s3914_s19 }
  0x41   : > { %2845 = dma.done.wait (%p3001_p6), %s458_s20, 2560  }
  0x42   : > { %2847 = vsyncadd (%p3001_p6), %s458_s20, 4294964736  ;;  %p547_p11 = scmp.lt.s32.totalorder %s2983_s25, 1  ;;  %v2879_v0 = vmov 0   ;;  %v3099_v2 = vld [vmem:[%s3068_s26 + $0x8] sm:$0xff]  ;;  %v3102_v3 = vld [vmem:[%s3068_s26 + $0x18] sm:$0xff]  ;;  %s2880_s27 = smov 2  }
  0x43   : > { %2550 = vset.pattern.permute.xlu0 %v2879_v0  ;;  %920 = vmatprep.mubr.bf16.mxu0 %v2879_v0  ;;  %v3105_v4 = vld [vmem:[%s3068_s26] sm:$0xff]  ;;  %v715_v6 = vand.u32 2147483647, %v3099_v2  ;;  %v717_v7 = vand.u32 2147483647, %v3102_v3  ;;  %v3113_v8 = vld [vmem:[%s3068_s26 + $0x10] sm:$0xff]  ;;  %v937_v10 = vpack.c.bf16 %v3102_v3, %v3099_v2 }
  0x44   : > { %s3078_s23 = scalar_select %p547_p11, %s2983_s25, 1  ;;  %981 = vmatprep.mubr.bf16.mxu1 %v2879_v0  ;;  %2551 = vset.pattern.permute.xlu1 %v2879_v0  ;;  %v714_v9 = vand.u32 2147483647, %v3105_v4  ;;  %v716_v13 = vand.u32 2147483647, %v3113_v8  ;;  %v3120_v14 = vld [vmem:[%s3068_s26 + $0x28] sm:$0xff]  ;;  %v936_v17 = vpack.c.bf16 %v3113_v8, %v3105_v4 }
  0x45   : > { %v735_v11 = vsub.f32 0.0, %v715_v6  ;;  %v737_v12 = vsub.f32 0.0, %v717_v7  ;;  %v3123_v15 = vld [vmem:[%s3068_s26 + $0x38] sm:$0xff]  ;;  %949 = vmatprep.subr.bf16.mxu1 %v937_v10  ;;  %v3129_v18 = vld [vmem:[%s3068_s26 + $0x20] sm:$0xff]  ;;  %v3132_v22 = vld [vmem:[%s3068_s26 + $0x30] sm:$0xff]  ;;  %v695_v61 = vmax.f32 %v3099_v2, 0.0 }
  0x46   : > { %s3083_s30 = sshll.u32 %s3078_s23, 3  ;;  %v734_v16 = vsub.f32 0.0, %v714_v9  ;;  %v736_v21 = vsub.f32 0.0, %v716_v13  ;;  %950 = vmatpush1.bf16.msra.mxu1 %v936_v17  ;;  %v719_v24 = vand.u32 2147483647, %v3120_v14  ;;  %v939_v26 = vpack.c.bf16 %v3123_v15, %v3120_v14  ;;  %v3141_v32 = vld [vmem:[%s3068_s26 + $0x48] sm:$0xff] }
  0x47   : > { %s3089_s29 = scalar_lea.vmem %s3897_s3, %s3083_s30  ;;  %s3095_s21 = scalar_lea.vmem %s3898_s4, %s3083_s30  ;;  %v756_v19 = vmul.f32 1.442695, %v735_v11  ;;  %v760_v20 = vmul.f32 1.442695, %v737_v12  ;;  %v721_v25 = vand.u32 2147483647, %v3123_v15  ;;  %v938_v34 = vpack.c.bf16 %v3132_v22, %v3129_v18 }
  0x48   : > { %v596_v1 = vld [vmem:[%s3089_s29] sm:$0xff]  ;;  %v754_v23 = vmul.f32 1.442695, %v734_v16  ;;  %v758_v27 = vmul.f32 1.442695, %v736_v21  ;;  %v739_v29 = vsub.f32 0.0, %v719_v24  ;;  %951 = vmatprep.subr.bf16.mxu1 %v939_v26  ;;  %s563_s13 = scalar_lea.vmem %s3899_s5, %s3083_s30  ;;  %s567_s18 = scalar_lea.vmem %s3900_s6, %s3083_s30 }
  0x49   : > { %930 = vperm.xlu0 %2550, %v596_v1   ;;  %v3108_v5 = vld [vmem:[%s3095_s21] sm:$0xff]  ;;  %2558 = vpow2.f32 %v756_v19  ;;  %v718_v28 = vand.u32 2147483647, %v3129_v18  ;;  %v741_v30 = vsub.f32 0.0, %v721_v25  ;;  %v720_v31 = vand.u32 2147483647, %v3132_v22  ;;  %s551_s20 = scalar_lea.vmem %s3895_s1, %s3083_s30 }
  0x4a   : > { %2560 = vpow2.f32 %v760_v20  ;;  %v3146_v35 = vld [vmem:[%s3068_s26 + $0x58] sm:$0xff]  ;;  %v3149_v36 = vld [vmem:[%s3068_s26 + $0x40] sm:$0xff]  ;;  %v764_v37 = vmul.f32 1.442695, %v739_v29  ;;  %v3152_v40 = vld [vmem:[%s3068_s26 + $0x50] sm:$0xff]  ;;  %952 = vmatpush1.bf16.msra.mxu1 %v938_v34  ;;  %v697_v62 = vmax.f32 %v3102_v3, 0.0 }
  0x4b   : > { %2562 = vpow2.f32 %v754_v23  ;;  %v738_v33 = vsub.f32 0.0, %v718_v28  ;;  %v768_v38 = vmul.f32 1.442695, %v741_v30  ;;  %v740_v39 = vsub.f32 0.0, %v720_v31  ;;  %v3159_v48 = vld [vmem:[%s3068_s26 + $0x68] sm:$0xff]  ;;  %v3166_v56 = vld [vmem:[%s3068_s26 + $0x78] sm:$0xff] }
  0x4c   : > { %2564 = vpow2.f32 %v758_v27  ;;  %v723_v42 = vand.u32 2147483647, %v3141_v32  ;;  %v725_v44 = vand.u32 2147483647, %v3146_v35  ;;  %v722_v46 = vand.u32 2147483647, %v3149_v36 }
  0x4d   : > { %1004 = vrot.lane.b32.xlu0 %v3108_v5, %s2880_s27  ;;  %v762_v41 = vmul.f32 1.442695, %v738_v33  ;;  %2566 = vpow2.f32 %v764_v37  ;;  %v766_v43 = vmul.f32 1.442695, %v740_v39  ;;  %v724_v47 = vand.u32 2147483647, %v3152_v40 }
  0x4e   : > { %2568 = vpow2.f32 %v768_v38  ;;  %v743_v45 = vsub.f32 0.0, %v723_v42  ;;  %v745_v49 = vsub.f32 0.0, %v725_v44  ;;  %v941_v50 = vpack.c.bf16 %v3146_v35, %v3141_v32  ;;  %v3172_v1 = vld [vmem:[%s3068_s26 + $0x60] sm:$0xff]  ;;  %v3177_v11 = vld [vmem:[%s3068_s26 + $0x70] sm:$0xff]  ;;  %v3187_v27 = vld [vmem:[%s3068_s26 + $0x88] sm:$0xff]  ;;  %s2885_s15 = smov 127  }
  0x4f   : > { %2570 = vpow2.f32 %v762_v41  ;;  %v940_v51 = vpack.c.bf16 %v3152_v40, %v3149_v36  ;;  %v742_v53 = vsub.f32 0.0, %v722_v46  ;;  %v744_v55 = vsub.f32 0.0, %v724_v47  ;;  %v3191_v33 = vld [vmem:[%s3068_s26 + $0x98] sm:$0xff]  ;;  %v3195_v41 = vld [vmem:[%s3068_s26 + $0x80] sm:$0xff]  ;;  %v3199_v46 = vld [vmem:[%s3068_s26 + $0x90] sm:$0xff]  ;;  %s2397_s30 = sshll.u32 %s3078_s23, 1 }
  0x50   : > { %2572 = vpow2.f32 %v766_v43  ;;  %v772_v52 = vmul.f32 1.442695, %v743_v45  ;;  %v776_v54 = vmul.f32 1.442695, %v745_v49  ;;  %953 = vmatprep.subr.bf16.mxu1 %v941_v50  ;;  %v727_v57 = vand.u32 2147483647, %v3159_v48  ;;  %s571_s28 = scalar_lea.vmem %s3901_s7, %s2397_s30 }
  0x51   : > { %v770_v59 = vmul.f32 1.442695, %v742_v53  ;;  %954 = vmatpush1.bf16.msra.mxu1 %v940_v51  ;;  %v694_v9 = vmax.f32 %v3105_v4, 0.0  ;;  %v729_v10 = vand.u32 2147483647, %v3166_v56  ;;  %v696_v19 = vmax.f32 %v3113_v8, 0.0 }
  0x52   : > { %2574 = vpow2.f32 %v772_v52  ;;  %v774_v16 = vmul.f32 1.442695, %v744_v55  ;;  %v747_v17 = vsub.f32 0.0, %v727_v57  ;;  %v726_v21 = vand.u32 2147483647, %v3172_v1  ;;  %p3930_p12 = scmp.ne.s32.totalorder %s3923_s14, 0 }
  0x53   : > { %v2559_v58 = vpop.eup %2558  ;;  %2576 = vpow2.f32 %v776_v54  ;;  %v728_v24 = vand.u32 2147483647, %v3177_v11  ;;  %v943_v25 = vpack.c.bf16 %v3166_v56, %v3159_v48  ;;  %v942_v26 = vpack.c.bf16 %v3177_v11, %v3172_v1 }
  0x54   : > { %v2561_v60 = vpop.eup %2560  ;;  %v795_v63 = vadd.f32 1.0, %v2559_v58  ;;  %2578 = vpow2.f32 %v770_v59  ;;  %v699_v29 = vmax.f32 %v3120_v14, 0.0  ;;  %v749_v31 = vsub.f32 0.0, %v729_v10 }
  0x55   : > { %v2563_v6 = vpop.eup %2562  ;;  %v797_v7 = vadd.f32 1.0, %v2561_v60  ;;  %v701_v37 = vmax.f32 %v3123_v15, 0.0  ;;  %v780_v39 = vmul.f32 1.442695, %v747_v17  ;;  %955 = vmatprep.subr.bf16.mxu1 %v943_v25  ;;  %v746_v44 = vsub.f32 0.0, %v726_v21 }
  0x56   : > { %v2565_v12 = vpop.eup %2564  ;;  %2580 = vlog2.f32 %v795_v63  ;;  %v794_v13 = vadd.f32 1.0, %v2563_v6  ;;  %956 = vmatpush1.bf16.msra.mxu1 %v942_v26  ;;  %v731_v45 = vand.u32 2147483647, %v3187_v27  ;;  %v748_v49 = vsub.f32 0.0, %v728_v24 }
  0x57   : > { %2582 = vlog2.f32 %v797_v7  ;;  %v796_v20 = vadd.f32 1.0, %v2565_v12  ;;  %v2567_v23 = vpop.eup %2566  ;;  %v733_v50 = vand.u32 2147483647, %v3191_v33  ;;  %v698_v52 = vmax.f32 %v3129_v18, 0.0 }
  0x58   : > { %2584 = vlog2.f32 %v794_v13  ;;  %v2569_v28 = vpop.eup %2568  ;;  %v799_v30 = vadd.f32 1.0, %v2567_v23  ;;  %v784_v53 = vmul.f32 1.442695, %v749_v31  ;;  %v730_v54 = vand.u32 2147483647, %v3195_v41 }
  0x59   : > { %2586 = vlog2.f32 %v796_v20  ;;  %v2571_v34 = vpop.eup %2570  ;;  %v801_v38 = vadd.f32 1.0, %v2569_v28  ;;  %v751_v58 = vsub.f32 0.0, %v731_v45  ;;  %v732_v59 = vand.u32 2147483647, %v3199_v46 }
  0x5a   : > { %2588 = vpow2.f32 %v774_v16  ;;  %v2573_v42 = vpop.eup %2572  ;;  %v798_v43 = vadd.f32 1.0, %v2571_v34  ;;  %v778_v6 = vmul.f32 1.442695, %v746_v44  ;;  %v753_v7 = vsub.f32 0.0, %v733_v50 }
  0x5b   : > { %2590 = vlog2.f32 %v799_v30  ;;  %v800_v47 = vadd.f32 1.0, %v2573_v42  ;;  %v782_v13 = vmul.f32 1.442695, %v748_v49  ;;  %v750_v16 = vsub.f32 0.0, %v730_v54 }
  0x5c   : > { %2592 = vlog2.f32 %v801_v38  ;;  %v2575_v51 = vpop.eup %2574  ;;  %v752_v21 = vsub.f32 0.0, %v732_v59  ;;  %v945_v23 = vpack.c.bf16 %v3191_v33, %v3187_v27  ;;  %v788_v26 = vmul.f32 1.442695, %v751_v58 }
  0x5d   : > { %2594 = vlog2.f32 %v798_v43  ;;  %v2577_v55 = vpop.eup %2576  ;;  %v803_v57 = vadd.f32 1.0, %v2575_v51  ;;  %v944_v28 = vpack.c.bf16 %v3199_v46, %v3195_v41  ;;  %v792_v38 = vmul.f32 1.442695, %v753_v7 }
  0x5e   : > { %2596 = vlog2.f32 %v800_v47  ;;  %v2579_v60 = vpop.eup %2578  ;;  %v805_v63 = vadd.f32 1.0, %v2577_v55  ;;  %957 = vmatprep.subr.bf16.mxu1 %v945_v23  ;;  %v786_v44 = vmul.f32 1.442695, %v750_v16  ;;  %v790_v2 = vmul.f32 1.442695, %v752_v21 }
  0x5f   : > { %2598 = vpow2.f32 %v780_v39  ;;  %v802_v12 = vadd.f32 1.0, %v2579_v60  ;;  %958 = vmatpush1.bf16.msra.mxu1 %v944_v28  ;;  %v700_v54 = vmax.f32 %v3132_v22, 0.0  ;;  %v2881_v58 = vmov 1  }
  0x60   : > { %v2581_v10 = vpop.eup %2580  ;;  %2600 = vlog2.f32 %v803_v57  ;;  %2552 = vset.pattern.permute.xlu0 %v2881_v58  ;;  %v703_v60 = vmax.f32 %v3141_v32, 0.0  ;;  %v704_v28 = vmax.f32 %v3152_v40, 0.0  ;;  %v711_v58 = vmax.f32 %v3187_v27, 0.0 }
  0x61   : > { %v2583_v17 = vpop.eup %2582  ;;  %v817_v20 = vmul.f32 0.6931472, %v2581_v10  ;;  %2602 = vlog2.f32 %v805_v63  ;;  %651 = vperm.xlu0 %2552, %v3108_v5   ;;  %vm884_vm0 = vcmask 654336  }
  0x62   : > { %v2585_v24 = vpop.eup %2584  ;;  %v821_v25 = vmul.f32 0.6931472, %v2583_v17  ;;  %2604 = vlog2.f32 %v802_v12  ;;  %v2882_v17 = vmov 2  }
  0x63   : > { %v2587_v30 = vpop.eup %2586  ;;  %v855_v31 = vadd.f32 %v817_v20, %v695_v61  ;;  %v815_v34 = vmul.f32 0.6931472, %v2585_v24  ;;  %2606 = vpow2.f32 %v784_v53 }
  0x64   : > { %v2589_v39 = vpop.eup %2588  ;;  %v857_v42 = vadd.f32 %v821_v25, %v697_v62  ;;  %v819_v43 = vmul.f32 0.6931472, %v2587_v30  ;;  %2608 = vpow2.f32 %v778_v6 }
  0x65   : > { %v2591_v45 = vpop.eup %2590  ;;  %v854_v47 = vadd.f32 %v815_v34, %v694_v9  ;;  %v804_v49 = vadd.f32 1.0, %v2589_v39  ;;  %2610 = vpow2.f32 %v782_v13  ;;  %2555 = vset.pattern.permute.xlu0 %v2882_v17 }
  0x66   : > { %v2593_v61 = vpop.eup %2592  ;;  %v875_v50 = vpack.c.bf16 %v857_v42, %v855_v31  ;;  %v856_v51 = vadd.f32 %v819_v43, %v696_v19  ;;  %v825_v53 = vmul.f32 0.6931472, %v2591_v45  ;;  %2612 = vpow2.f32 %v788_v26 }
  0x67   : > { %v2595_v3 = vpop.eup %2594  ;;  %v829_v62 = vmul.f32 0.6931472, %v2593_v61  ;;  %2614 = vlog2.f32 %v804_v49  ;;  %v707_v61 = vmax.f32 %v3159_v48, 0.0 }
  0x68   : > { %v2597_v55 = vpop.eup %2596  ;;  %888 = vmatprep.subr.bf16.mxu0 %v875_v50  ;;  %v874_v57 = vpack.c.bf16 %v856_v51, %v854_v47  ;;  %v859_v4 = vadd.f32 %v825_v53, %v699_v29  ;;  %v823_v9 = vmul.f32 0.6931472, %v2595_v3  ;;  %2616 = vpow2.f32 %v792_v38 }
  0x69   : > { %v2599_v59 = vpop.eup %2598  ;;  %v861_v8 = vadd.f32 %v829_v62, %v701_v37  ;;  %v827_v19 = vmul.f32 0.6931472, %v2597_v55  ;;  %2618 = vpow2.f32 %v786_v44  ;;  %v705_v29 = vmax.f32 %v3146_v35, 0.0 }
  0x6a   : > { %v2601_v22 = vpop.eup %2600  ;;  %889 = vmatpush1.bf16.msra.mxu0 %v874_v57  ;;  %v858_v14 = vadd.f32 %v823_v9, %v698_v52  ;;  %v807_v63 = vadd.f32 1.0, %v2599_v59  ;;  %2620 = vpow2.f32 %v790_v2  ;;  %v702_v35 = vmax.f32 %v3149_v36, 0.0 }
  0x6b   : > { %v2603_v6 = vpop.eup %2602  ;;  %v877_v7 = vpack.c.bf16 %v861_v8, %v859_v4  ;;  %v860_v10 = vadd.f32 %v827_v19, %v700_v54  ;;  %v833_v15 = vmul.f32 0.6931472, %v2601_v22  ;;  %v709_v51 = vmax.f32 %v3166_v56, 0.0 }
  0x6c   : > { %v2605_v37 = vpop.eup %2604  ;;  %v837_v12 = vmul.f32 0.6931472, %v2603_v6  ;;  %2622 = vlog2.f32 %v807_v63  ;;  %v706_v3 = vmax.f32 %v3172_v1, 0.0  ;;  %v708_v57 = vmax.f32 %v3177_v11, 0.0 }
  0x6d   : > { %v2607_v32 = vpop.eup %2606  ;;  %890 = vmatprep.subr.bf16.mxu0 %v877_v7  ;;  %v876_v13 = vpack.c.bf16 %v860_v10, %v858_v14  ;;  %v863_v16 = vadd.f32 %v833_v15, %v703_v60  ;;  %v831_v20 = vmul.f32 0.6931472, %v2605_v37  ;;  %v713_v60 = vmax.f32 %v3191_v33, 0.0 }
  0x6e   : > { %v2609_v18 = vpop.eup %2608  ;;  %v865_v52 = vadd.f32 %v837_v12, %v705_v29  ;;  %v809_v21 = vadd.f32 1.0, %v2607_v32  ;;  %v710_v1 = vmax.f32 %v3195_v41, 0.0  ;;  %v712_v11 = vmax.f32 %v3199_v46, 0.0 }
  0x6f   : > { %v2611_v23 = vpop.eup %2610  ;;  %891 = vmatpush1.bf16.msra.mxu0 %v876_v13  ;;  %v806_v24 = vadd.f32 1.0, %v2609_v18  ;;  %v862_v42 = vadd.f32 %v831_v20, %v702_v35  ;;  %v2883_v41 = vmov 1065369472   ;;  %v2884_v18 = vmov 0.0  }
  0x70   : > { %v2613_v25 = vpop.eup %2612  ;;  %v879_v26 = vpack.c.bf16 %v865_v52, %v863_v16  ;;  %2624 = vlog2.f32 %v809_v21  ;;  %v808_v30 = vadd.f32 1.0, %v2611_v23  ;;  %v601_v46 = vlaneseq }
  0x71   : > { %v2615_v31 = vpop.eup %2614  ;;  %2626 = vlog2.f32 %v806_v24  ;;  %v811_v34 = vadd.f32 1.0, %v2613_v25 }
  0x72   : > { %v2617_v38 = vpop.eup %2616  ;;  %892 = vmatprep.subr.bf16.mxu0 %v879_v26  ;;  %v835_v39 = vmul.f32 0.6931472, %v2615_v31  ;;  %2628 = vlog2.f32 %v808_v30  ;;  %v3240_v52 = vand.u32 127, %v601_v46  ;;  %v2886_v26 = vmov 3   ;;  %v599_v30 = vld [vmem:[%s567_s18] sm:$0xff]  ;;  %s2887_s18 = smov 4  }
  0x73   : > { %v2619_v36 = vpop.eup %2618  ;;  %v813_v43 = vadd.f32 1.0, %v2617_v38  ;;  %2630 = vlog2.f32 %v811_v34 }
  0x74   : > { %v2621_v44 = vpop.eup %2620  ;;  %v864_v45 = vadd.f32 %v835_v39, %v704_v28  ;;  %v810_v47 = vadd.f32 1.0, %v2619_v36  ;;  %v598_v28 = vld [vmem:[%s563_s13] sm:$0xff] }
  0x75   : > { %2632 = vlog2.f32 %v813_v43  ;;  %v812_v49 = vadd.f32 1.0, %v2621_v44  ;;  %vm676_vm2 = vcmp.gt.f32.partialorder %v598_v28, 0.0  ;;  %v3260_v43 = vshrl.u32 %v601_v46, 7 }
  0x76   : > { %v2623_v2 = vpop.eup %2622  ;;  %v878_v40 = vpack.c.bf16 %v864_v45, %v862_v42  ;;  %2634 = vlog2.f32 %v810_v47 }
  0x77   : > { %v841_v50 = vmul.f32 0.6931472, %v2623_v2  ;;  %2636 = vlog2.f32 %v812_v49 }
  0x78   : > { %893 = vmatpush1.bf16.msra.mxu0 %v878_v40 }
  0x79   : > { %v867_v55 = vadd.f32 %v841_v50, %v707_v61 }
  0x7a   : > { %v2625_v53 = vpop.eup %2624 }
  0x7b   : > { %v2627_v62 = vpop.eup %2626  ;;  %v845_v54 = vmul.f32 0.6931472, %v2625_v53 }
  0x7c   : > { %v2629_v4 = vpop.eup %2628  ;;  %v839_v9 = vmul.f32 0.6931472, %v2627_v62 }
  0x7d   : > { %v2631_v59 = vpop.eup %2630  ;;  %v869_v8 = vadd.f32 %v845_v54, %v709_v51  ;;  %v843_v48 = vmul.f32 0.6931472, %v2629_v4  ;;  %v3275_v51 = vld [vmem:[%s551_s20] sm:$0xff]  ;;  %v3282_v54 = vsub.s32 1, %v3260_v43  ;;  %v1084_v4 = vsub.s32 5, %v3260_v43  ;;  %s3522_s20 = sshll.u32 %s2983_s25, 5 }
  0x7e   : > { %v866_v19 = vadd.f32 %v839_v9, %v706_v3  ;;  %v849_v22 = vmul.f32 0.6931472, %v2631_v59  ;;  %v1010_v53 = vrot.slane %v3275_v51, 6  ;;  %v3292_v9 = vsub.s32 3, %v3260_v43  ;;  %s3528_s13 = scalar_lea.hbm %s3905_s11, %s3522_s20 }
  0x7f   : > { %v2633_v56 = vpop.eup %2632  ;;  %v881_v14 = vpack.c.bf16 %v869_v8, %v867_v55  ;;  %v868_v29 = vadd.f32 %v843_v48, %v708_v57  ;;  %v3285_v55 = vsub.s32 2, %v3260_v43  ;;  %v3288_v57 = vsub.s32 4, %v3260_v43 }
  0x80   : > { %v2635_v63 = vpop.eup %2634  ;;  %v853_v6 = vmul.f32 0.6931472, %v2633_v56  ;;  %v871_v7 = vadd.f32 %v849_v22, %v711_v58  ;;  %v1012_v62 = vsub.f32 %v3275_v51, %v1010_v53  ;;  %v1020_v58 = vsub.s32 6, %v3260_v43 }
  0x81   : > { %v2637_v10 = vpop.eup %2636  ;;  %894 = vmatprep.subr.bf16.mxu0 %v881_v14  ;;  %v880_v27 = vpack.c.bf16 %v868_v29, %v866_v19  ;;  %v847_v15 = vmul.f32 0.6931472, %v2635_v63  ;;  %v3296_v59 = vsub.s32 7, %v3260_v43  ;;  %v1081_v48 = vrot.slane %v3275_v51, %v3282_v54 }
  0x82   : > { %v873_v37 = vadd.f32 %v853_v6, %v713_v60  ;;  %v851_v12 = vmul.f32 0.6931472, %v2637_v10  ;;  %v1013_v8 = vadd.f32 1e-07, %v1012_v62  ;;  %v1017_v60 = vrot.slane %v3275_v51, %v3285_v55 }
  0x83   : > { %895 = vmatpush1.bf16.msra.mxu0 %v880_v27  ;;  %v870_v32 = vadd.f32 %v847_v15, %v710_v1  ;;  %v1041_v56 = vrot.slane %v3275_v51, %v3288_v57  ;;  %v1085_v14 = vrot.slane %v3275_v51, %v1084_v4  ;;  %v1021_v29 = vrot.slane %v3275_v51, %v1020_v58 }
  0x84   : > { %v883_v33 = vpack.c.bf16 %v873_v37, %v871_v7  ;;  %v872_v13 = vadd.f32 %v851_v12, %v712_v11  ;;  %v1061_v1 = vrot.slane %v3275_v51, %v3292_v9  ;;  %v1065_v63 = vrot.slane %v3275_v51, %v3296_v59 }
  0x85   : > { %v2403_v6 = vrot.slane %v1013_v8, 9  ;;  %v1091_v7 = vrot.slane %v1081_v48, %v3282_v54  ;;  %v1027_v10 = vrot.slane %v1017_v60, %v3285_v55  ;;  %v1095_v37 = vrot.slane %v1085_v14, %v3282_v54 }
  0x86   : > { %896 = vmatprep.subr.bf16.mxu0 %v883_v33  ;;  %v882_v16 = vpack.c.bf16 %v872_v13, %v870_v32  ;;  %v1031_v12 = vrot.slane %v1021_v29, %v3285_v55  ;;  %v1071_v32 = vrot.slane %v1061_v1, %v3292_v9  ;;  %v1075_v33 = vrot.slane %v1065_v63, %v3292_v9 }
  0x88   : > { %897 = vmatpush1.bf16.msra.mxu0 %v882_v16 }
  0x8b   : > { %2400 = vmatmul.mubr.msk.bf16.vlgmr.msra.gmra.mrb[0].mxu0 %vm884_vm0, %v2883_v41 }
  0x8c   : > { %1822 = vmatprep.mubr.f32.mxu0 %v2884_v18 }
  0xc8   : > { %v931_v35 = vpop.permute.xlu0 %930 }
  0xc9   : > { %vm932_vm1 = vcmp.eq.s32.totalorder %v3240_v52, %v931_v35 }
  0xca   : > { %v2401_v20 = vsel %vm932_vm1, 1.0, %v2884_v18 }
  0xcb   : > { %v935_v21 = vpack.c.bf16 %v2401_v20, %v2401_v20 }
  0xcc   : > { %v1005_v23 = vpop.permute.xlu0 %1004 }
  0xcd   : > { %v1007_v24 = vsub.f32 %v3108_v5, %v1005_v23  ;;  %2402 = vmatmul.mubr.msk.bf16.vlgmr.msra.gmra.mrb[0].mxu1 %vm884_vm0, %v935_v21  ;;  %v1113_v21 = vmul.f32 %v2403_v6, %v1012_v62  ;;  %v1168_v62 = vrot.slane %v1010_v53, 4 }
  0xcf   : > { %v1008_v25 = vadd.f32 1e-07, %v1007_v24  ;;  %v1123_v28 = vrot.slane %v1113_v21, %v3285_v55 }
  0xd1   : > { %1105 = vrot.lane.b32.xlu1 %v1008_v25, %s2885_s15  ;;  %s3916_s15 = sand.u32 1, %s2983_s25  }
  0xd2   : > { %s3534_s23 = scalar_lea.sflag [#allocation10], %s3916_s15 }
  0xd5   : > { %627 = vperm.xlu1 %2551, %v3108_v5  }
  0xd9   : > { %2553 = vset.pattern.permute.xlu1 %v2882_v17  ;;  %v677_v17 = vsel %vm676_vm2, 1, %v2879_v0 }
  0xda   : > { %659 = vperm.xlu1 %2553, %v3108_v5  }
  0xde   : > { %2554 = vset.pattern.permute.xlu1 %v2886_v26 }
  0xdf   : > { %665 = vperm.xlu1 %2554, %v3108_v5   ;;  %v3263_v5 = vsub.s32 0, %v3260_v43 }
  0xe0   : > { %v3317_v11 = vpop.permute.xlu0 %651 }
  0xe1   : > { %v1037_v22 = vrot.slane %v3275_v51, %v3263_v5  ;;  %v1051_v15 = vrot.slane %v1041_v56, %v3263_v5  ;;  %v1096_v13 = vmax.f32 %v3317_v11, %v1091_v7  ;;  %v1097_v20 = vmax.f32 %v3317_v11, %v1095_v37 }
  0xe3   : > { %2556 = vset.pattern.permute.xlu1 %v2879_v0  ;;  %v1047_v27 = vrot.slane %v1037_v22, %v3263_v5 }
  0xe4   : > { %1237 = vperm.xlu1 %2556, %v599_v30   ;;  %v1127_v30 = vrot.slane %v1113_v21, %v1020_v58  ;;  %v600_v58 = vld [vmem:[%s571_s28] sm:$0x3] }
  0xe5   : > { %v1228_v53 = vrot.slane %v600_v58, %v3263_v5 }
  0xe8   : > { %679 = vperm.xlu1 %2556, %v677_v17  }
 0x143   : > { %v1106_v31 = vpop.permute.xlu1 %1105 }
 0x144   : > { %v1108_v34 = vmul.f32 %v1106_v31, %v1007_v24 }
 0x146   : > { %1116 = vperm.xlu0 %2555, %v1108_v34  }
 0x154   : > { %v3278_v3 = vpop.permute.xlu1 %627 }
 0x155   : > { %v1052_v41 = vmax.f32 %v3278_v3, %v1047_v27  ;;  %v1053_v35 = vmax.f32 %v3278_v3, %v1051_v15  ;;  %v1150_v14 = vmin.f32 %v3278_v3, %v1047_v27  ;;  %v1151_v29 = vmin.f32 %v3278_v3, %v1051_v15 }
 0x159   : > { %v3300_v19 = vpop.permute.xlu1 %659 }
 0x15a   : > { %v1032_v23 = vmin.f32 %v3300_v19, %v1027_v10  ;;  %v1033_v24 = vmin.f32 %v3300_v19, %v1031_v12  ;;  %v1148_v56 = vmax.f32 %v3300_v19, %v1027_v10  ;;  %v1170_v10 = vadd.f32 %v1168_v62, %v3275_v51 }
 0x15c   : > { %v1054_v17 = vsub.f32 %v1032_v23, %v1052_v41  ;;  %v1055_v31 = vsub.f32 %v1033_v24, %v1053_v35  ;;  %v1201_v51 = vrot.slane %v1170_v10, %v1084_v4 }
 0x15e   : > { %v922_v38 = vpop.f32.mrb[0].mxu0  ;;  %v3327_v16 = vpop.permute.xlu1 %665 }
 0x15f   : > { %v924_v39 = vpop.f32.mrb[1].mxu0  ;;  %v993_v44 = vrot.slane %v922_v38, %v3263_v5  ;;  %v1076_v25 = vmin.f32 %v3327_v16, %v1071_v32  ;;  %v1077_v26 = vmin.f32 %v3327_v16, %v1075_v33  ;;  %v1154_v1 = vmax.f32 %v3327_v16, %v1071_v32 }
 0x160   : > { %v926_v42 = vpop.f32.mrb[2].mxu0  ;;  %v997_v45 = vrot.slane %v924_v39, %v3263_v5  ;;  %v1133_v39 = vrot.slane %v1123_v28, %v3285_v55  ;;  %v1179_v28 = vrot.slane %v1170_v10, %v3288_v57 }
 0x161   : > { %v927_v36 = vpop.f32.mrb[3].mxu0  ;;  %v1098_v34 = vsub.f32 %v1076_v25, %v1096_v13  ;;  %v1099_v38 = vsub.f32 %v1077_v26, %v1097_v20  ;;  %v1137_v42 = vrot.slane %v1127_v30, %v3285_v55  ;;  %v1232_v13 = vrot.slane %v600_v58, %v3282_v54 }
 0x162   : > { %v1056_v36 = vmax.f32 %v1054_v17, 0.0  ;;  %v1152_v20 = vsub.f32 %v1148_v56, %v1150_v14 }
 0x163   : > { %v1238_v21 = vpop.permute.xlu1 %1237 }
 0x164   : > { %v1240_v23 = vsub.f32 %v1228_v53, %v1238_v21  ;;  %v1241_v24 = vsub.f32 %v1232_v13, %v1238_v21  ;;  %v1160_v25 = vmul.f32 %v1152_v20, %v1152_v20 }
 0x1a0   : > { %v983_v47 = vpop.f32.mrb[0].mxu1 }
 0x1a1   : > { %v3267_v49 = vsub.f32 %v983_v47, %v993_v44  ;;  %v985_v2 = vpop.f32.mrb[1].mxu1  ;;  %v1057_v44 = vmax.f32 %v1055_v31, 0.0  ;;  %v1101_v47 = vmax.f32 %v1099_v38, 0.0  ;;  %v1242_v31 = vmul.f32 %v1240_v23, %v1240_v23  ;;  %v595_v38 = vld [vmem:[%s3896_s2] sm:$0xf] }
 0x1a2   : > { %v3269_v40 = vsub.f32 %v985_v2, %v997_v45  ;;  %v987_v61 = vpop.f32.mrb[2].mxu1  ;;  %v1100_v45 = vmax.f32 %v1098_v34, 0.0  ;;  %v1243_v34 = vmul.f32 %v1241_v24, %v1241_v24  ;;  %v610_v4 = vrot.slane %v595_v38, %v3263_v5 }
 0x1a3   : > { %v988_v50 = vpop.f32.mrb[3].mxu1  ;;  %v1156_v61 = vmin.f32 %v3317_v11, %v1091_v7  ;;  %v1103_v48 = vmul.f32 %v1101_v47, %v1057_v44  ;;  %v1149_v7 = vmax.f32 %v3300_v19, %v1031_v12  ;;  %v1175_v12 = vrot.slane %v1170_v10, %v3263_v5 }
 0x1a4   : > { %v1157_v50 = vmin.f32 %v3317_v11, %v1095_v37  ;;  %v1102_v8 = vmul.f32 %v1100_v45, %v1056_v36  ;;  %v1155_v37 = vmax.f32 %v3327_v16, %v1075_v33  ;;  %v1197_v33 = vrot.slane %v1170_v10, %v3282_v54 }
 0x1a5   : > { %v1158_v27 = vsub.f32 %v1154_v1, %v1156_v61  ;;  %v1153_v15 = vsub.f32 %v1149_v7, %v1151_v29  ;;  %v1189_v44 = vrot.slane %v1179_v28, %v3263_v5  ;;  %v1211_v45 = vrot.slane %v1201_v51, %v3282_v54 }
 0x1a6   : > { %v1159_v32 = vsub.f32 %v1155_v37, %v1157_v50  ;;  %v635_v61 = vrot.slane %v595_v38, %v3282_v54  ;;  %v3370_v62 = vmul.f32 0.40528473, %v1243_v34  ;;  %v620_v53 = vrot.slane %v610_v4, %v3263_v5 }
 0x1a7   : > { %v1162_v26 = vmul.f32 %v1158_v27, %v1158_v27  ;;  %v1161_v30 = vmul.f32 %v1153_v15, %v1153_v15  ;;  %v1191_v29 = vsub.f32 %v1189_v44, %v3278_v3  ;;  %v1213_v1 = vsub.f32 %v1211_v45, %v3317_v11 }
 0x1a8   : > { %v1163_v17 = vmul.f32 %v1159_v32, %v1159_v32  ;;  %v645_v13 = vrot.slane %v635_v61, %v3282_v54  ;;  %v630_v15 = vsub.f32 %v620_v53, %v3278_v3  ;;  %v662_v23 = vsub.f32 %v3300_v19, %v620_v53 }
 0x1a9   : > { %v1164_v36 = vadd.f32 %v1162_v26, %v1160_v25 }
 0x1aa   : > { %v1165_v47 = vadd.f32 %v1163_v17, %v1161_v30  ;;  %v654_v32 = vsub.f32 %v645_v13, %v3317_v11  ;;  %v668_v24 = vsub.f32 %v3327_v16, %v645_v13 }
 0x1ab   : > { %v1166_v14 = vadd.f32 1e-07, %v1164_v36 }
 0x1ac   : > { %v1167_v37 = vadd.f32 1e-07, %v1165_v47  ;;  %v656_v30 = vmin.f32 %v630_v15, %v654_v32  ;;  %v670_v17 = vmin.f32 %v662_v23, %v668_v24 }
 0x1ae   : > { %v672_v44 = vmin.f32 %v656_v30, %v670_v17 }
 0x1b0   : > { %vm674_vm3 = vcmp.gt.f32.partialorder %v672_v44, 1e-09 }
 0x1c5   : > { %v1117_v2 = vpop.permute.xlu0 %1116 }
 0x1c6   : > { %v1138_v60 = vadd.f32 %v1133_v39, %v1117_v2  ;;  %v1139_v22 = vadd.f32 %v1137_v42, %v1117_v2  ;;  %v1185_v39 = vrot.slane %v1175_v12, %v3263_v5  ;;  %v1207_v42 = vrot.slane %v1197_v33, %v3282_v54 }
 0x1c7   : > { %v3366_v2 = vmul.f32 0.40528473, %v1242_v31 }
 0x1c8   : > { %v1140_v63 = vsub.f32 %v1138_v60, %v1102_v8  ;;  %v1141_v6 = vsub.f32 %v1139_v22, %v1103_v48  ;;  %v1190_v58 = vsub.f32 %v1185_v39, %v3278_v3  ;;  %v1212_v60 = vsub.f32 %v1207_v42, %v3317_v11 }
 0x1ca   : > { %v1142_v41 = vadd.f32 1e-07, %v1140_v63  ;;  %v1143_v35 = vadd.f32 1e-07, %v1141_v6  ;;  %v614_v63 = vrot.slane %v595_v38, %v3285_v55  ;;  %v639_v6 = vrot.slane %v595_v38, %v3292_v9 }
 0x1cb   : > { %v1193_v55 = vsub.f32 %v1191_v29, %v3300_v19  ;;  %v1215_v9 = vsub.f32 %v1213_v1, %v3327_v16  ;;  %v1002_v29 = vmul.f32 1.442695, %v3269_v40 }
 0x1cc   : > { %2638 = vrcp.f32 %v1142_v41  ;;  %v1192_v41 = vsub.f32 %v1190_v58, %v3300_v19  ;;  %v624_v20 = vrot.slane %v614_v63, %v3263_v5  ;;  %v649_v27 = vrot.slane %v639_v6, %v3282_v54 }
 0x1cd   : > { %2640 = vrcp.f32 %v1143_v35  ;;  %v1214_v35 = vsub.f32 %v1212_v60, %v3327_v16  ;;  %v1217_v25 = vmul.f32 %v1193_v55, %v1193_v55  ;;  %v1219_v26 = vmul.f32 %v1215_v9, %v1215_v9 }
 0x1ce   : > { %2642 = vrcp.f32 %v1166_v14  ;;  %v1216_v12 = vmul.f32 %v1192_v41, %v1192_v41  ;;  %v631_v5 = vsub.f32 %v624_v20, %v3278_v3  ;;  %v655_v54 = vsub.f32 %v649_v27, %v3317_v11  ;;  %v680_v3 = vpop.permute.xlu1 %679 }
 0x1cf   : > { %2644 = vrcp.f32 %v1167_v37  ;;  %v1218_v33 = vmul.f32 %v1214_v35, %v1214_v35  ;;  %v663_v28 = vsub.f32 %v3300_v19, %v624_v20  ;;  %v669_v51 = vsub.f32 %v3327_v16, %v649_v27 }
 0x1d0   : > { %v1221_v34 = vadd.f32 %v1219_v26, %v1217_v25  ;;  %v657_v38 = vmin.f32 %v631_v5, %v655_v54  ;;  %v1000_v60 = vmul.f32 1.442695, %v3267_v49  ;;  %vm681_vm4 = vcmp.eq.s32.totalorder %v680_v3, 1 }
 0x1d1   : > { %v1220_v31 = vadd.f32 %v1218_v33, %v1216_v12  ;;  %v671_v39 = vmin.f32 %v663_v28, %v669_v51  ;;  %vm682_vm6 = vmand %vm674_vm3, %vm681_vm4  ;;  %v603_v55 = vadd.s32 128, %v3240_v52 }
 0x1d2   : > { %v1223_v4 = vmul.f32 0.25, %v1221_v34  ;;  %v3411_v49 = vsel %vm682_vm6, 1.0, %v2884_v18 }
 0x1d3   : > { %v1222_v45 = vmul.f32 0.25, %v1220_v31  ;;  %v1279_v32 = vsub.s32 255, %v603_v55 }
 0x1d6   : > { %v2639_v50 = vpop.eup %2638 }
 0x1d7   : > { %v2641_v22 = vpop.eup %2640  ;;  %v3374_v56 = vmul.f32 %v2639_v50, %v1102_v8  ;;  %v673_v50 = vmin.f32 %v657_v38, %v671_v39 }
 0x1d8   : > { %v3380_v7 = vmul.f32 %v2641_v22, %v1103_v48  ;;  %v2643_v42 = vpop.eup %2642 }
 0x1d9   : > { %v1246_v8 = vsub.f32 %v3366_v2, %v3374_v56  ;;  %v2645_v36 = vpop.eup %2644  ;;  %v1255_v16 = vmul.f32 %v2643_v42, %v1222_v45  ;;  %vm675_vm5 = vcmp.gt.f32.partialorder %v673_v50, 1e-09 }
 0x1da   : > { %v1247_v10 = vsub.f32 %v3370_v62, %v3380_v7  ;;  %v1257_v22 = vmul.f32 %v2645_v36, %v1223_v4  ;;  %vm683_vm7 = vmand %vm675_vm5, %vm681_vm4 }
 0x1db   : > { %v1248_v48 = vadd.f32 1.0000001, %v1246_v8 }
 0x1dc   : > { %v1249_v21 = vadd.f32 1.0000001, %v1247_v10 }
 0x1dd   : > { %2646 = vrcp.f32 %v1248_v48 }
 0x1de   : > { %2648 = vrcp.f32 %v1249_v21  ;;  %v1278_v21 = vsub.s32 255, %v3240_v52 }
 0x1df   : > { %2650 = vpow2.f32 %v1000_v60 }
 0x1e0   : > { %2652 = vpow2.f32 %v1002_v29 }
 0x1e7   : > { %v2647_v47 = vpop.eup %2646 }
 0x1e8   : > { %v2649_v61 = vpop.eup %2648  ;;  %v1251_v11 = vmul.f32 %v2647_v47, %v3366_v2 }
 0x1e9   : > { %v1253_v19 = vmul.f32 %v2649_v61, %v3370_v62  ;;  %v2651_v10 = vpop.eup %2650 }
 0x1ea   : > { %v1258_v58 = vmul.f32 %v1251_v11, %v3366_v2  ;;  %v2653_v48 = vpop.eup %2652 }
 0x1eb   : > { %v1259_v14 = vmul.f32 %v1253_v19, %v3370_v62  ;;  %v3414_v62 = vsel %vm683_vm7, 1.0, %v2884_v18 }
 0x1ec   : > { %v1260_v1 = vadd.f32 %v1258_v58, %v1255_v16 }
 0x1ed   : > { %v1261_v63 = vadd.f32 %v1259_v14, %v1257_v22 }
 0x1ee   : > { %v1262_v6 = vsub.f32 %v3374_v56, %v1260_v1 }
 0x1ef   : > { %v1263_v37 = vsub.f32 %v3380_v7, %v1261_v63 }
 0x1f0   : > { %v1264_v2 = vmax.f32 %v1262_v6, 0.0 }
 0x1f1   : > { %v1265_v53 = vmax.f32 %v1263_v37, 0.0 }
 0x1f2   : > { %v3417_v40 = vmul.f32 %v3411_v49, %v1264_v2 }
 0x1f3   : > { %v3420_v13 = vmul.f32 %v3414_v62, %v1265_v53 }
 0x1f4   : > { %v1268_v56 = vmul.f32 %v3417_v40, %v3417_v40 }
 0x1f5   : > { %v1269_v7 = vmul.f32 %v3420_v13, %v3420_v13 }
 0x1f6   : > { %v1270_v8 = vmul.f32 %v1268_v56, %v1268_v56 }
 0x1f7   : > { %v1271_v41 = vmul.f32 %v1269_v7, %v1269_v7 }
 0x1f8   : > { %v1272_v35 = vmul.f32 %v1270_v8, %v1268_v56 }
 0x1f9   : > { %v1273_v9 = vmul.f32 %v1271_v41, %v1269_v7 }
 0x1fa   : > { %v1274_v20 = vmul.f32 %v2651_v10, %v1272_v35 }
 0x1fb   : > { %v1275_v27 = vmul.f32 %v2653_v48, %v1273_v9 }
 0x1fc   : > { %v3429_v15 = vmul.f32 %v3411_v49, %v1274_v20 }
 0x1fd   : > { %v3432_v23 = vmul.f32 %v3414_v62, %v1275_v27 }
 0x1fe   : > { %v1284_v24 = vand.u32 4294967040, %v3429_v15 }
 0x1ff   : > { %v1285_v12 = vand.u32 4294967040, %v3432_v23 }
 0x200   : > { %v1286_v33 = vor.u32 %v1284_v24, %v1278_v21 }
 0x201   : > { %v1287_v25 = vor.u32 %v1285_v12, %v1279_v32 }
 0x203   : > { %vm1288_vm8 = vcmp.gt.s32.totalorder %v1286_v33, %v1287_v25 }
 0x204   : > { %v1289_v26 = vsel %vm1288_vm8, %v1286_v33, %v1287_v25 }
 0x205   : > { %v1291_v5 = vshra.s32 %v1289_v26, 16  ;;  %v1290_v28 = vand.u32 65535, %v1289_v26 }
 0x207   : > { %v1293_v54 = vcvt.s32.f32 %v1291_v5  ;;  %v1292_v51 = vcvt.s32.f32 %v1290_v28 }
 0x209   : > { %1294 = vmax.xlane.f32.xlu0 %v1293_v54 }
 0x296   : > { %v1295_v52 = vpop.xlane.xlu0 %1294 }
 0x297   : > { %vm1296_vm9 = vcmp.eq.f32.partialorder %v1293_v54, %v1295_v52  ;;  %v1301_v17 = vcvt.f32.s32 %v1295_v52 }
 0x298   : > { %v1297_v30 = vsel %vm1296_vm9, %v1292_v51, -inf }
 0x299   : > { %1298 = vmax.xlane.f32.xlu1 %v1297_v30  ;;  %v1302_v34 = vshll.u32 %v1301_v17, 16 }
 0x326   : > { %v1299_v31 = vpop.xlane.xlu1 %1298 }
 0x327   : > { %v1300_v38 = vcvt.f32.s32 %v1299_v31 }
 0x329   : > { %v1303_v39 = vadd.s32 %v1302_v34, %v1300_v38 }
 0x32b   : > { %vm1304_vm10 = vcmp.eq.s32.totalorder %v1286_v33, %v1303_v39  ;;  %vm1305_vm11 = vcmp.eq.s32.totalorder %v1287_v25, %v1303_v39 }
 0x32c   : > { %v1312_v42 = vsel %vm1304_vm10, 2147483648, %v1286_v33  ;;  %v1313_v36 = vsel %vm1305_vm11, 2147483648, %v1287_v25  ;;  %v2404_v22 = vsel %vm1304_vm10, 1.0, %v2884_v18  ;;  %v2405_v14 = vsel %vm1305_vm11, 1.0, %v2884_v18 }
 0x32d   : > { %vm1314_vm12 = vcmp.gt.s32.totalorder %v1312_v42, %v1313_v36 }
 0x32e   : > { %v1315_v44 = vsel %vm1314_vm12, %v1312_v42, %v1313_v36 }
 0x32f   : > { %v1317_v45 = vshra.s32 %v1315_v44, 16  ;;  %v1316_v4 = vand.u32 65535, %v1315_v44 }
 0x331   : > { %v1319_v47 = vcvt.s32.f32 %v1317_v45  ;;  %v1318_v3 = vcvt.s32.f32 %v1316_v4 }
 0x333   : > { %1320 = vmax.xlane.f32.xlu0 %v1319_v47 }
 0x3c0   : > { %v1321_v61 = vpop.xlane.xlu0 %1320 }
 0x3c1   : > { %vm1322_vm13 = vcmp.eq.f32.partialorder %v1319_v47, %v1321_v61  ;;  %v1327_v11 = vcvt.f32.s32 %v1321_v61 }
 0x3c2   : > { %v1323_v50 = vsel %vm1322_vm13, %v1318_v3, -inf }
 0x3c3   : > { %1324 = vmax.xlane.f32.xlu0 %v1323_v50  ;;  %v1328_v16 = vshll.u32 %v1327_v11, 16 }
 0x450   : > { %v1325_v19 = vpop.xlane.xlu0 %1324 }
 0x451   : > { %v1326_v58 = vcvt.f32.s32 %v1325_v19 }
 0x453   : > { %v1329_v60 = vadd.s32 %v1328_v16, %v1326_v58 }
 0x455   : > { %vm1330_vm14 = vcmp.eq.s32.totalorder %v1312_v42, %v1329_v60  ;;  %vm1331_vm15 = vcmp.eq.s32.totalorder %v1313_v36, %v1329_v60 }
 0x456   : > { %v2406_v29 = vsel %vm1330_vm14, 1.0, %v2884_v18  ;;  %v2407_v1 = vsel %vm1331_vm15, 1.0, %v2884_v18  ;;  %v1338_v63 = vsel %vm1330_vm14, 2147483648, %v1312_v42  ;;  %v1339_v6 = vsel %vm1331_vm15, 2147483648, %v1313_v36 }
 0x457   : > { %v1336_v37 = vadd.f32 %v2406_v29, %v2404_v22  ;;  %v1337_v2 = vadd.f32 %v2407_v1, %v2405_v14  ;;  %vm1340_vm0 = vcmp.gt.s32.totalorder %v1338_v63, %v1339_v6 }
 0x458   : > { %v1341_v53 = vsel %vm1340_vm0, %v1338_v63, %v1339_v6 }
 0x459   : > { %v1343_v56 = vshra.s32 %v1341_v53, 16  ;;  %v1342_v8 = vand.u32 65535, %v1341_v53 }
 0x45b   : > { %v1345_v7 = vcvt.s32.f32 %v1343_v56  ;;  %v1344_v35 = vcvt.s32.f32 %v1342_v8 }
 0x45d   : > { %1346 = vmax.xlane.f32.xlu1 %v1345_v7 }
 0x4ea   : > { %v1347_v41 = vpop.xlane.xlu1 %1346 }
 0x4eb   : > { %vm1348_vm1 = vcmp.eq.f32.partialorder %v1345_v7, %v1347_v41  ;;  %v1353_v55 = vcvt.f32.s32 %v1347_v41 }
 0x4ec   : > { %v1349_v10 = vsel %vm1348_vm1, %v1344_v35, -inf }
 0x4ed   : > { %1350 = vmax.xlane.f32.xlu0 %v1349_v10  ;;  %v1354_v48 = vshll.u32 %v1353_v55, 16 }
 0x57a   : > { %v1351_v9 = vpop.xlane.xlu0 %1350 }
 0x57b   : > { %v1352_v20 = vcvt.f32.s32 %v1351_v9 }
 0x57d   : > { %v1355_v27 = vadd.s32 %v1354_v48, %v1352_v20 }
 0x57f   : > { %vm1356_vm2 = vcmp.eq.s32.totalorder %v1338_v63, %v1355_v27  ;;  %vm1357_vm3 = vcmp.eq.s32.totalorder %v1339_v6, %v1355_v27 }
 0x580   : > { %v2408_v21 = vsel %vm1356_vm2, 1.0, %v2884_v18  ;;  %v2409_v32 = vsel %vm1357_vm3, 1.0, %v2884_v18  ;;  %v1364_v24 = vsel %vm1356_vm2, 2147483648, %v1338_v63  ;;  %v1365_v12 = vsel %vm1357_vm3, 2147483648, %v1339_v6 }
 0x581   : > { %v1362_v33 = vadd.f32 %v2408_v21, %v1336_v37  ;;  %v1363_v25 = vadd.f32 %v2409_v32, %v1337_v2  ;;  %vm1366_vm4 = vcmp.gt.s32.totalorder %v1364_v24, %v1365_v12 }
 0x582   : > { %v1367_v26 = vsel %vm1366_vm4, %v1364_v24, %v1365_v12 }
 0x583   : > { %v1369_v5 = vshra.s32 %v1367_v26, 16  ;;  %v1368_v28 = vand.u32 65535, %v1367_v26 }
 0x585   : > { %v1371_v54 = vcvt.s32.f32 %v1369_v5  ;;  %v1370_v51 = vcvt.s32.f32 %v1368_v28 }
 0x587   : > { %1372 = vmax.xlane.f32.xlu1 %v1371_v54 }
 0x614   : > { %v1373_v52 = vpop.xlane.xlu1 %1372 }
 0x615   : > { %vm1374_vm5 = vcmp.eq.f32.partialorder %v1371_v54, %v1373_v52  ;;  %v1379_v17 = vcvt.f32.s32 %v1373_v52 }
 0x616   : > { %v1375_v30 = vsel %vm1374_vm5, %v1370_v51, -inf }
 0x617   : > { %1376 = vmax.xlane.f32.xlu0 %v1375_v30  ;;  %v1380_v34 = vshll.u32 %v1379_v17, 16 }
 0x6a4   : > { %v1377_v31 = vpop.xlane.xlu0 %1376 }
 0x6a5   : > { %v1378_v38 = vcvt.f32.s32 %v1377_v31 }
 0x6a7   : > { %v1381_v39 = vadd.s32 %v1380_v34, %v1378_v38 }
 0x6a9   : > { %vm1382_vm6 = vcmp.eq.s32.totalorder %v1364_v24, %v1381_v39  ;;  %vm1383_vm7 = vcmp.eq.s32.totalorder %v1365_v12, %v1381_v39 }
 0x6aa   : > { %v2410_v42 = vsel %vm1382_vm6, 1.0, %v2884_v18  ;;  %v2411_v36 = vsel %vm1383_vm7, 1.0, %v2884_v18  ;;  %v1390_v44 = vsel %vm1382_vm6, 2147483648, %v1364_v24  ;;  %v1391_v45 = vsel %vm1383_vm7, 2147483648, %v1365_v12 }
 0x6ab   : > { %v1388_v47 = vadd.f32 %v2410_v42, %v1362_v33  ;;  %v1389_v4 = vadd.f32 %v2411_v36, %v1363_v25  ;;  %vm1392_vm8 = vcmp.gt.s32.totalorder %v1390_v44, %v1391_v45 }
 0x6ac   : > { %v1393_v61 = vsel %vm1392_vm8, %v1390_v44, %v1391_v45 }
 0x6ad   : > { %v1395_v3 = vshra.s32 %v1393_v61, 16  ;;  %v1394_v11 = vand.u32 65535, %v1393_v61 }
 0x6af   : > { %v1397_v50 = vcvt.s32.f32 %v1395_v3  ;;  %v1396_v16 = vcvt.s32.f32 %v1394_v11 }
 0x6b1   : > { %1398 = vmax.xlane.f32.xlu1 %v1397_v50 }
 0x73e   : > { %v1399_v19 = vpop.xlane.xlu1 %1398 }
 0x73f   : > { %vm1400_vm9 = vcmp.eq.f32.partialorder %v1397_v50, %v1399_v19  ;;  %v1405_v60 = vcvt.f32.s32 %v1399_v19 }
 0x740   : > { %v1401_v58 = vsel %vm1400_vm9, %v1396_v16, -inf }
 0x741   : > { %1402 = vmax.xlane.f32.xlu0 %v1401_v58  ;;  %v1406_v14 = vshll.u32 %v1405_v60, 16 }
 0x7ce   : > { %v1403_v22 = vpop.xlane.xlu0 %1402 }
 0x7cf   : > { %v1404_v29 = vcvt.f32.s32 %v1403_v22 }
 0x7d1   : > { %v1407_v1 = vadd.s32 %v1406_v14, %v1404_v29 }
 0x7d3   : > { %vm1408_vm10 = vcmp.eq.s32.totalorder %v1390_v44, %v1407_v1  ;;  %vm1409_vm11 = vcmp.eq.s32.totalorder %v1391_v45, %v1407_v1 }
 0x7d4   : > { %v2412_v63 = vsel %vm1408_vm10, 1.0, %v2884_v18  ;;  %v2413_v6 = vsel %vm1409_vm11, 1.0, %v2884_v18  ;;  %v1416_v37 = vsel %vm1408_vm10, 2147483648, %v1390_v44  ;;  %v1417_v2 = vsel %vm1409_vm11, 2147483648, %v1391_v45 }
 0x7d5   : > { %v1414_v53 = vadd.f32 %v2412_v63, %v1388_v47  ;;  %v1415_v56 = vadd.f32 %v2413_v6, %v1389_v4  ;;  %vm1418_vm12 = vcmp.gt.s32.totalorder %v1416_v37, %v1417_v2 }
 0x7d6   : > { %v1419_v7 = vsel %vm1418_vm12, %v1416_v37, %v1417_v2 }
 0x7d7   : > { %v1421_v8 = vshra.s32 %v1419_v7, 16  ;;  %v1420_v35 = vand.u32 65535, %v1419_v7 }
 0x7d9   : > { %v1423_v41 = vcvt.s32.f32 %v1421_v8  ;;  %v1422_v55 = vcvt.s32.f32 %v1420_v35 }
 0x7db   : > { %1424 = vmax.xlane.f32.xlu1 %v1423_v41 }
 0x868   : > { %v1425_v10 = vpop.xlane.xlu1 %1424 }
 0x869   : > { %vm1426_vm13 = vcmp.eq.f32.partialorder %v1423_v41, %v1425_v10  ;;  %v1431_v48 = vcvt.f32.s32 %v1425_v10 }
 0x86a   : > { %v1427_v9 = vsel %vm1426_vm13, %v1422_v55, -inf }
 0x86b   : > { %1428 = vmax.xlane.f32.xlu0 %v1427_v9  ;;  %v1432_v27 = vshll.u32 %v1431_v48, 16 }
 0x8f8   : > { %v1429_v20 = vpop.xlane.xlu0 %1428 }
 0x8f9   : > { %v1430_v21 = vcvt.f32.s32 %v1429_v20 }
 0x8fb   : > { %v1433_v32 = vadd.s32 %v1432_v27, %v1430_v21 }
 0x8fd   : > { %vm1434_vm14 = vcmp.eq.s32.totalorder %v1416_v37, %v1433_v32  ;;  %vm1435_vm15 = vcmp.eq.s32.totalorder %v1417_v2, %v1433_v32 }
 0x8fe   : > { %v2414_v24 = vsel %vm1434_vm14, 1.0, %v2884_v18  ;;  %v2415_v12 = vsel %vm1435_vm15, 1.0, %v2884_v18  ;;  %v1442_v33 = vsel %vm1434_vm14, 2147483648, %v1416_v37  ;;  %v1443_v25 = vsel %vm1435_vm15, 2147483648, %v1417_v2 }
 0x8ff   : > { %v1440_v26 = vadd.f32 %v2414_v24, %v1414_v53  ;;  %v1441_v5 = vadd.f32 %v2415_v12, %v1415_v56  ;;  %vm1444_vm0 = vcmp.gt.s32.totalorder %v1442_v33, %v1443_v25 }
 0x900   : > { %v1445_v54 = vsel %vm1444_vm0, %v1442_v33, %v1443_v25 }
 0x901   : > { %v1447_v28 = vshra.s32 %v1445_v54, 16  ;;  %v1446_v51 = vand.u32 65535, %v1445_v54 }
 0x903   : > { %v1449_v52 = vcvt.s32.f32 %v1447_v28  ;;  %v1448_v17 = vcvt.s32.f32 %v1446_v51 }
 0x905   : > { %1450 = vmax.xlane.f32.xlu1 %v1449_v52 }
 0x992   : > { %v1451_v30 = vpop.xlane.xlu1 %1450 }
 0x993   : > { %vm1452_vm1 = vcmp.eq.f32.partialorder %v1449_v52, %v1451_v30  ;;  %v1457_v34 = vcvt.f32.s32 %v1451_v30 }
 0x994   : > { %v1453_v31 = vsel %vm1452_vm1, %v1448_v17, -inf }
 0x995   : > { %1454 = vmax.xlane.f32.xlu0 %v1453_v31  ;;  %v1458_v39 = vshll.u32 %v1457_v34, 16 }
 0xa22   : > { %v1455_v38 = vpop.xlane.xlu0 %1454 }
 0xa23   : > { %v1456_v42 = vcvt.f32.s32 %v1455_v38 }
 0xa25   : > { %v1459_v36 = vadd.s32 %v1458_v39, %v1456_v42 }
 0xa27   : > { %vm1460_vm2 = vcmp.eq.s32.totalorder %v1442_v33, %v1459_v36  ;;  %vm1461_vm3 = vcmp.eq.s32.totalorder %v1443_v25, %v1459_v36 }
 0xa28   : > { %v2416_v44 = vsel %vm1460_vm2, 1.0, %v2884_v18  ;;  %v2417_v45 = vsel %vm1461_vm3, 1.0, %v2884_v18  ;;  %v1468_v47 = vsel %vm1460_vm2, 2147483648, %v1442_v33  ;;  %v1469_v4 = vsel %vm1461_vm3, 2147483648, %v1443_v25 }
 0xa29   : > { %v1466_v61 = vadd.f32 %v2416_v44, %v1440_v26  ;;  %v1467_v3 = vadd.f32 %v2417_v45, %v1441_v5  ;;  %vm1470_vm4 = vcmp.gt.s32.totalorder %v1468_v47, %v1469_v4 }
 0xa2a   : > { %v1471_v50 = vsel %vm1470_vm4, %v1468_v47, %v1469_v4 }
 0xa2b   : > { %v1473_v11 = vshra.s32 %v1471_v50, 16  ;;  %v1472_v16 = vand.u32 65535, %v1471_v50 }
 0xa2d   : > { %v1475_v19 = vcvt.s32.f32 %v1473_v11  ;;  %v1474_v60 = vcvt.s32.f32 %v1472_v16 }
 0xa2f   : > { %1476 = vmax.xlane.f32.xlu1 %v1475_v19 }
 0xabc   : > { %v1477_v58 = vpop.xlane.xlu1 %1476 }
 0xabd   : > { %vm1478_vm5 = vcmp.eq.f32.partialorder %v1475_v19, %v1477_v58  ;;  %v1483_v14 = vcvt.f32.s32 %v1477_v58 }
 0xabe   : > { %v1479_v22 = vsel %vm1478_vm5, %v1474_v60, -inf }
 0xabf   : > { %1480 = vmax.xlane.f32.xlu0 %v1479_v22  ;;  %v1484_v1 = vshll.u32 %v1483_v14, 16 }
 0xb4c   : > { %v1481_v29 = vpop.xlane.xlu0 %1480 }
 0xb4d   : > { %v1482_v63 = vcvt.f32.s32 %v1481_v29 }
 0xb4f   : > { %v1485_v6 = vadd.s32 %v1484_v1, %v1482_v63 }
 0xb51   : > { %vm1486_vm6 = vcmp.eq.s32.totalorder %v1468_v47, %v1485_v6  ;;  %vm1487_vm7 = vcmp.eq.s32.totalorder %v1469_v4, %v1485_v6 }
 0xb52   : > { %v2418_v37 = vsel %vm1486_vm6, 1.0, %v2884_v18  ;;  %v2419_v2 = vsel %vm1487_vm7, 1.0, %v2884_v18  ;;  %v1494_v53 = vsel %vm1486_vm6, 2147483648, %v1468_v47  ;;  %v1495_v56 = vsel %vm1487_vm7, 2147483648, %v1469_v4 }
 0xb53   : > { %v1492_v7 = vadd.f32 %v2418_v37, %v1466_v61  ;;  %v1493_v8 = vadd.f32 %v2419_v2, %v1467_v3  ;;  %vm1496_vm8 = vcmp.gt.s32.totalorder %v1494_v53, %v1495_v56 }
 0xb54   : > { %v1497_v41 = vsel %vm1496_vm8, %v1494_v53, %v1495_v56 }
 0xb55   : > { %v1499_v35 = vshra.s32 %v1497_v41, 16  ;;  %v1498_v55 = vand.u32 65535, %v1497_v41 }
 0xb57   : > { %v1501_v10 = vcvt.s32.f32 %v1499_v35  ;;  %v1500_v48 = vcvt.s32.f32 %v1498_v55 }
 0xb59   : > { %1502 = vmax.xlane.f32.xlu1 %v1501_v10 }
 0xbe6   : > { %v1503_v9 = vpop.xlane.xlu1 %1502 }
 0xbe7   : > { %vm1504_vm9 = vcmp.eq.f32.partialorder %v1501_v10, %v1503_v9  ;;  %v1509_v27 = vcvt.f32.s32 %v1503_v9 }
 0xbe8   : > { %v1505_v20 = vsel %vm1504_vm9, %v1500_v48, -inf }
 0xbe9   : > { %1506 = vmax.xlane.f32.xlu0 %v1505_v20  ;;  %v1510_v32 = vshll.u32 %v1509_v27, 16 }
 0xc76   : > { %v1507_v21 = vpop.xlane.xlu0 %1506 }
 0xc77   : > { %v1508_v24 = vcvt.f32.s32 %v1507_v21 }
 0xc79   : > { %v1511_v12 = vadd.s32 %v1510_v32, %v1508_v24 }
 0xc7b   : > { %vm1512_vm10 = vcmp.eq.s32.totalorder %v1494_v53, %v1511_v12  ;;  %vm1513_vm11 = vcmp.eq.s32.totalorder %v1495_v56, %v1511_v12 }
 0xc7c   : > { %v2420_v33 = vsel %vm1512_vm10, 1.0, %v2884_v18  ;;  %v2421_v25 = vsel %vm1513_vm11, 1.0, %v2884_v18  ;;  %v1520_v26 = vsel %vm1512_vm10, 2147483648, %v1494_v53  ;;  %v1521_v5 = vsel %vm1513_vm11, 2147483648, %v1495_v56 }
 0xc7d   : > { %v1518_v54 = vadd.f32 %v2420_v33, %v1492_v7  ;;  %v1519_v28 = vadd.f32 %v2421_v25, %v1493_v8  ;;  %vm1522_vm12 = vcmp.gt.s32.totalorder %v1520_v26, %v1521_v5  ;;  %vm1720_vm10 = vcmask 31744  }
 0xc7e   : > { %v1523_v52 = vsel %vm1522_vm12, %v1520_v26, %v1521_v5 }
 0xc7f   : > { %v1525_v51 = vshra.s32 %v1523_v52, 16  ;;  %v1524_v17 = vand.u32 65535, %v1523_v52 }
 0xc81   : > { %v1527_v30 = vcvt.s32.f32 %v1525_v51  ;;  %v1526_v34 = vcvt.s32.f32 %v1524_v17 }
 0xc83   : > { %1528 = vmax.xlane.f32.xlu1 %v1527_v30 }
 0xd10   : > { %v1529_v31 = vpop.xlane.xlu1 %1528 }
 0xd11   : > { %vm1530_vm13 = vcmp.eq.f32.partialorder %v1527_v30, %v1529_v31  ;;  %v1535_v39 = vcvt.f32.s32 %v1529_v31 }
 0xd12   : > { %v1531_v38 = vsel %vm1530_vm13, %v1526_v34, -inf  ;;  %v2656_v34 = vld [vmem:[%s3089_s29] sm:$0xff]  ;;  %s3492_s29 = sshll.u32 %s3062_s17, 1 }
 0xd13   : > { %1532 = vmax.xlane.f32.xlu0 %v1531_v38  ;;  %v1536_v36 = vshll.u32 %v1535_v39, 16  ;;  %v1715_v38 = vcvt.s32.f32 %v2656_v34  ;;  %s3915_s27 = scalar_lea.vmem [#allocation11], %s3492_s29 }
 0xda0   : > { %v1533_v42 = vpop.xlane.xlu0 %1532 }
 0xda1   : > { %v1534_v44 = vcvt.f32.s32 %v1533_v42 }
 0xda3   : > { %v1537_v45 = vadd.s32 %v1536_v36, %v1534_v44 }
 0xda5   : > { %vm1538_vm14 = vcmp.eq.s32.totalorder %v1520_v26, %v1537_v45  ;;  %vm1539_vm15 = vcmp.eq.s32.totalorder %v1521_v5, %v1537_v45 }
 0xda6   : > { %v2422_v47 = vsel %vm1538_vm14, 1.0, %v2884_v18  ;;  %v2423_v4 = vsel %vm1539_vm15, 1.0, %v2884_v18  ;;  %v1546_v61 = vsel %vm1538_vm14, 2147483648, %v1520_v26  ;;  %v1547_v3 = vsel %vm1539_vm15, 2147483648, %v1521_v5 }
 0xda7   : > { %v1544_v50 = vadd.f32 %v2422_v47, %v1518_v54  ;;  %v1545_v11 = vadd.f32 %v2423_v4, %v1519_v28  ;;  %vm1548_vm0 = vcmp.gt.s32.totalorder %v1546_v61, %v1547_v3  ;;  %v2657_v47 = vld [vmem:[%s3095_s21] sm:$0xff]  ;;  %s539_s21 = scalar_lea.vmem [#allocation9], %s3492_s29 }
 0xda8   : > { %v1549_v19 = vsel %vm1548_vm0, %v1546_v61, %v1547_v3  ;;  %s2104_s28 = sshll.u32 %s539_s21, 4  ;;  %s2105_s28 = int_to_ptr.vmem [resolvable:$true] %s2104_s28 }
 0xda9   : > { %v1551_v16 = vshra.s32 %v1549_v19, 16  ;;  %v1550_v60 = vand.u32 65535, %v1549_v19  ;;  %s2688_s16 = scalar_lea.vmem %s2105_s28, 32 }
 0xdaa   : > { %p2689_p6 = scmp.ne.s32.totalorder %s2105_s28, %s2688_s16 }
 0xdab   : > { %v1553_v58 = vcvt.s32.f32 %v1551_v16  ;;  %v1552_v14 = vcvt.s32.f32 %v1550_v60 }
 0xdac   : > { %p2690_p13 = pnand %p2689_p6, %p3930_p12 }
 0xdad   : > { %1554 = vmax.xlane.f32.xlu1 %v1553_v58 }
 0xdae   : > { %p2691_p8 = pneg %p2690_p13 }
 0xe3a   : > { %v1555_v22 = vpop.xlane.xlu1 %1554 }
 0xe3b   : > { %vm1556_vm1 = vcmp.eq.f32.partialorder %v1553_v58, %v1555_v22  ;;  %v1561_v1 = vcvt.f32.s32 %v1555_v22 }
 0xe3c   : > { %v1557_v29 = vsel %vm1556_vm1, %v1552_v14, -inf }
 0xe3d   : > { %1558 = vmax.xlane.f32.xlu0 %v1557_v29  ;;  %v1562_v6 = vshll.u32 %v1561_v1, 16 }
 0xeca   : > { %v1559_v63 = vpop.xlane.xlu0 %1558 }
 0xecb   : > { %v1560_v37 = vcvt.f32.s32 %v1559_v63 }
 0xecd   : > { %v1563_v2 = vadd.s32 %v1562_v6, %v1560_v37 }
 0xecf   : > { %vm1564_vm2 = vcmp.eq.s32.totalorder %v1546_v61, %v1563_v2  ;;  %vm1565_vm3 = vcmp.eq.s32.totalorder %v1547_v3, %v1563_v2 }
 0xed0   : > { %v2424_v53 = vsel %vm1564_vm2, 1.0, %v2884_v18  ;;  %v2425_v56 = vsel %vm1565_vm3, 1.0, %v2884_v18  ;;  %v1572_v7 = vsel %vm1564_vm2, 2147483648, %v1546_v61  ;;  %v1573_v8 = vsel %vm1565_vm3, 2147483648, %v1547_v3 }
 0xed1   : > { %v1570_v41 = vadd.f32 %v2424_v53, %v1544_v50  ;;  %v1571_v35 = vadd.f32 %v2425_v56, %v1545_v11  ;;  %vm1574_vm4 = vcmp.gt.s32.totalorder %v1572_v7, %v1573_v8  ;;  %v1645_v61 = vand.u32 4294967288, %v3417_v40 }
 0xed2   : > { %v1575_v10 = vsel %vm1574_vm4, %v1572_v7, %v1573_v8  ;;  %v1646_v3 = vand.u32 4294967288, %v3420_v13 }
 0xed3   : > { %v1577_v55 = vshra.s32 %v1575_v10, 16  ;;  %v1576_v48 = vand.u32 65535, %v1575_v10  ;;  %v1647_v50 = vor.u32 %v1645_v61, %v3296_v59 }
 0xed4   : > { %v1648_v11 = vor.u32 %v1646_v3, %v3296_v59 }
 0xed5   : > { %v1579_v9 = vcvt.s32.f32 %v1577_v55  ;;  %v1578_v27 = vcvt.s32.f32 %v1576_v48  ;;  %v1649_v19 = vrot.slane %v1647_v50, 4 }
 0xed6   : > { %v1658_v16 = vrot.slane %v1648_v11, 4 }
 0xed7   : > { %1580 = vmax.xlane.f32.xlu1 %v1579_v9  ;;  %vm1650_vm11 = vcmp.gt.s32.totalorder %v1647_v50, %v1649_v19 }
 0xed8   : > { %vm1659_vm12 = vcmp.gt.s32.totalorder %v1648_v11, %v1658_v16  ;;  %v1651_v58 = vsel %vm1650_vm11, %v1647_v50, %v1649_v19 }
 0xed9   : > { %v1660_v22 = vsel %vm1659_vm12, %v1648_v11, %v1658_v16  ;;  %v1652_v14 = vrot.slane %v1651_v58, 2 }
 0xeda   : > { %v1661_v1 = vrot.slane %v1660_v22, 2 }
 0xedb   : > { %vm1653_vm13 = vcmp.gt.s32.totalorder %v1651_v58, %v1652_v14 }
 0xedc   : > { %vm1662_vm14 = vcmp.gt.s32.totalorder %v1660_v22, %v1661_v1  ;;  %v1654_v53 = vsel %vm1653_vm13, %v1651_v58, %v1652_v14 }
 0xedd   : > { %v1655_v10 = vrot.slane %v1654_v53, 1 }
 0xedf   : > { %vm1656_vm1 = vcmp.gt.s32.totalorder %v1654_v53, %v1655_v10 }
 0xf64   : > { %v1581_v20 = vpop.xlane.xlu1 %1580 }
 0xf65   : > { %vm1582_vm5 = vcmp.eq.f32.partialorder %v1579_v9, %v1581_v20  ;;  %v1587_v32 = vcvt.f32.s32 %v1581_v20 }
 0xf66   : > { %v1583_v21 = vsel %vm1582_vm5, %v1578_v27, -inf }
 0xf67   : > { %1584 = vmax.xlane.f32.xlu0 %v1583_v21  ;;  %v1588_v12 = vshll.u32 %v1587_v32, 16 }
 0xff4   : > { %v1585_v24 = vpop.xlane.xlu0 %1584 }
 0xff5   : > { %v1586_v33 = vcvt.f32.s32 %v1585_v24  ;;  %v2888_v24 = vmov 1966171168  }
 0xff7   : > { %v1589_v25 = vadd.s32 %v1588_v12, %v1586_v33  ;;  %v1972_v12 = vunpack.c.l.s4 %v2888_v24  ;;  %v1657_v33 = vsel %vm1656_vm1, %v1654_v53, %v1655_v10 }
 0xff8   : > { %vm1667_vm3 = vcmp.eq.s32.totalorder %v1647_v50, %v1657_v33 }
 0xff9   : > { %vm1590_vm6 = vcmp.eq.s32.totalorder %v1572_v7, %v1589_v25  ;;  %vm1591_vm7 = vcmp.eq.s32.totalorder %v1573_v8, %v1589_v25 }
 0xffa   : > { %v2426_v26 = vsel %vm1590_vm6, 1.0, %v2884_v18  ;;  %v2427_v5 = vsel %vm1591_vm7, 1.0, %v2884_v18  ;;  %v1598_v54 = vsel %vm1590_vm6, 2147483648, %v1572_v7  ;;  %v1599_v28 = vsel %vm1591_vm7, 2147483648, %v1573_v8 }
 0xffb   : > { %v1596_v52 = vadd.f32 %v2426_v26, %v1570_v41  ;;  %v1597_v51 = vadd.f32 %v2427_v5, %v1571_v35  ;;  %vm1600_vm8 = vcmp.gt.s32.totalorder %v1598_v54, %v1599_v28  ;;  %v1663_v8 = vsel %vm1662_vm14, %v1660_v22, %v1661_v1 }
 0xffc   : > { %v1601_v30 = vsel %vm1600_vm8, %v1598_v54, %v1599_v28  ;;  %v1664_v55 = vrot.slane %v1663_v8, 1  ;;  %vm3501_vm7 = vcmp.lt.s32.totalorder %v601_v46, 256 }
 0xffd   : > { %v1603_v17 = vshra.s32 %v1601_v30, 16  ;;  %v1602_v39 = vand.u32 65535, %v1601_v30 }
 0xffe   : > { %vm1665_vm2 = vcmp.gt.s32.totalorder %v1663_v8, %v1664_v55 }
 0xfff   : > { %v1605_v31 = vcvt.s32.f32 %v1603_v17  ;;  %v1604_v36 = vcvt.s32.f32 %v1602_v39  ;;  %v1666_v5 = vsel %vm1665_vm2, %v1663_v8, %v1664_v55 }
0x1000   : > { %vm1668_vm4 = vcmp.eq.s32.totalorder %v1648_v11, %v1666_v5 }
0x1001   : > { %1606 = vmax.xlane.f32.xlu1 %v1605_v31  ;;  %v2431_v30 = vsel %vm1668_vm4, 1.0, %v2884_v18 }
0x1012   : > { %1717 = vrot.lane.b32.xlu1 %v1715_v38, %s2887_s18  ;;  %s2890_s18 = smov [#allocation9]  }
0x1013   : > { %s2692_s19 = sshll.u32 %s2890_s18, 4  ;;  %s2693_s19 = int_to_ptr.vmem [resolvable:$false] %s2692_s19 }
0x1014   : > { %p2695_p10 = scmp.lt.s32.totalorder %s2105_s28, %s2693_s19 }
0x108e   : > { %v1607_v42 = vpop.xlane.xlu1 %1606 }
0x108f   : > { %vm1608_vm9 = vcmp.eq.f32.partialorder %v1605_v31, %v1607_v42  ;;  %v1613_v60 = vcvt.f32.s32 %v1607_v42 }
0x1090   : > { %v1609_v44 = vsel %vm1608_vm9, %v1604_v36, -inf }
0x1091   : > { %1610 = vmax.xlane.f32.xlu0 %v1609_v44  ;;  %v1614_v63 = vshll.u32 %v1613_v60, 16 }
0x1092   : > { %v1718_v45 = vpop.permute.xlu1 %1717 }
0x1093   : > { %v1721_v4 = vsel %vm1720_vm10, %v2657_v47, %v1718_v45 }
0x10be   : > { %1722 = vxpose.xlu0.b32.start.end [1/1] (short) (narrow) %v1721_v4, 8 }
0x10e7   : > { %2557 = vset.pattern.permute.xlu0 %v2879_v0 }
0x111e   : > { %v1611_v29 = vpop.xlane.xlu0 %1610 }
0x111f   : > { %v1612_v0 = vcvt.f32.s32 %v1611_v29 }
0x1121   : > { %v1615_v6 = vadd.s32 %v1614_v63, %v1612_v0 }
0x1123   : > { %vm1616_vm15 = vcmp.eq.s32.totalorder %v1598_v54, %v1615_v6  ;;  %vm1617_vm0 = vcmp.eq.s32.totalorder %v1599_v28, %v1615_v6 }
0x1124   : > { %v2428_v37 = vsel %vm1616_vm15, 1.0, %v2884_v18  ;;  %v2429_v2 = vsel %vm1617_vm0, 1.0, %v2884_v18  ;;  %vm1754_vm15 = vcmask 64512  }
0x1125   : > { %v1622_v56 = vadd.f32 %v2428_v37, %v1596_v52  ;;  %v1623_v7 = vadd.f32 %v2429_v2, %v1597_v51  ;;  %v2430_v51 = vsel %vm1667_vm3, 1.0, %v2884_v18 }
0x1127   : > { %v1624_v41 = vmul.f32 %v3411_v49, %v1622_v56  ;;  %v1625_v35 = vmul.f32 %v3414_v62, %v1623_v7  ;;  %v1973_v62 = vunpack.c.0.s8 %v1972_v12  ;;  %v2889_v7 = vmov 1.0  }
0x1129   : > { %v1629_v9 = vrot.slane %v1624_v41, 4  ;;  %v1635_v48 = vrot.slane %v1625_v35, 4  ;;  %v3478_v17 = vsub.s32 %v1973_v62, %v3260_v43 }
0x112b   : > { %v1630_v20 = vadd.f32 %v1629_v9, %v1624_v41  ;;  %v1636_v27 = vadd.f32 %v1635_v48, %v1625_v35 }
0x112d   : > { %v1631_v21 = vrot.slane %v1630_v20, 2  ;;  %v1637_v32 = vrot.slane %v1636_v27, 2 }
0x112f   : > { %v1632_v25 = vadd.f32 %v1631_v21, %v1630_v20  ;;  %v1638_v26 = vadd.f32 %v1637_v32, %v1636_v27 }
0x1131   : > { %v1633_v54 = vrot.slane %v1632_v25, 1  ;;  %v1639_v49 = vrot.slane %v1638_v26, 1 }
0x1133   : > { %v1634_v28 = vadd.f32 %v1633_v54, %v1632_v25  ;;  %v1640_v52 = vadd.f32 %v1639_v49, %v1638_v26 }
0x1135   : > { %vm1641_vm5 = vcmp.gt.f32.partialorder %v1634_v28, 1.0  ;;  %vm1642_vm6 = vcmp.gt.f32.partialorder %v1640_v52, 1.0 }
0x1136   : > { %v1677_v31 = vsel %vm1641_vm5, %v2430_v51, %v1624_v41  ;;  %v1678_v34 = vsel %vm1642_vm6, %v2431_v30, %v1625_v35  ;;  %v3480_v38 = vsel %vm1641_vm5, 1.0, %v1634_v28  ;;  %v3482_v39 = vsel %vm1642_vm6, 1.0, %v1640_v52 }
0x1137   : > { %v2462_v42 = vtrunc.f32 %v1678_v34  ;;  %v1845_v36 = vmul.f32 %v1677_v31, %v3417_v40  ;;  %v1846_v44 = vmul.f32 %v1678_v34, %v3420_v13  ;;  %v1992_v45 = vcombine.low %v3480_v38, %v3482_v39 }
0x1138   : > { %v2460_v47 = vtrunc.f32 %v1677_v31  ;;  %v3489_v18 = vmul.f32 %v1677_v31, %v3429_v15  ;;  %v3495_v3 = vmul.f32 %v1678_v34, %v3432_v23 }
0x1139   : > { %v2463_v4 = vcvt.f32.s32 %v2462_v42  ;;  %v1847_v61 = vmax.f32 %v1845_v36, %v1846_v44  ;;  %v1999_v40 = vrot.slane %v1992_v45, %v3478_v17 }
0x113a   : > { %v2461_v50 = vcvt.f32.s32 %v2460_v47  ;;  %v1842_v11 = vmax.f32 %v3489_v18, %v3495_v3 }
0x113b   : > { %v1684_v13 = vmul.u32 8, %v2463_v4  ;;  %1848 = vmax.xlane.f32.xlu0 %v1847_v61  ;;  %v2006_v16 = vrot.slane %v1999_v40, %v3478_v17 }
0x113c   : > { %v1683_v19 = vmul.u32 8, %v2461_v50  ;;  %1843 = vmax.xlane.f32.xlu1 %v1842_v11 }
0x113d   : > { %v1686_v58 = vadd.s32 %v1684_v13, %v3296_v59  ;;  %2008 = vst.msk [vmem:[%s539_s21] sm:$0x3] %vm3501_vm7, %v2006_v16 }
0x113e   : > { %v1685_v23 = vadd.s32 %v1683_v19, %v3296_v59  ;;  %v1738_v53 = vpop.trf.xlu0 }
0x113f   : > { %v1696_v60 = vrot.slane %v1686_v58, 4 }
0x1140   : > { %v1687_v22 = vrot.slane %v1685_v23, 4 }
0x1141   : > { %vm1697_vm8 = vcmp.gt.s32.totalorder %v1686_v58, %v1696_v60 }
0x1142   : > { %v1698_v46 = vsel %vm1697_vm8, %v1686_v58, %v1696_v60  ;;  %vm1688_vm9 = vcmp.gt.s32.totalorder %v1685_v23, %v1687_v22 }
0x1143   : > { %v1699_v14 = vrot.slane %v1698_v46, 2  ;;  %v1689_v29 = vsel %vm1688_vm9, %v1685_v23, %v1687_v22 }
0x1144   : > { %v1690_v1 = vrot.slane %v1689_v29, 2 }
0x1145   : > { %vm1700_vm10 = vcmp.gt.s32.totalorder %v1698_v46, %v1699_v14 }
0x1146   : > { %v1701_v63 = vsel %vm1700_vm10, %v1698_v46, %v1699_v14  ;;  %vm1691_vm11 = vcmp.gt.s32.totalorder %v1689_v29, %v1690_v1 }
0x1147   : > { %v1702_v0 = vrot.slane %v1701_v63, 1  ;;  %v1692_v6 = vsel %vm1691_vm11, %v1689_v29, %v1690_v1 }
0x1148   : > { %v1693_v37 = vrot.slane %v1692_v6, 1 }
0x1149   : > { %vm1703_vm12 = vcmp.gt.s32.totalorder %v1701_v63, %v1702_v0 }
0x114a   : > { %v1704_v59 = vsel %vm1703_vm12, %v1701_v63, %v1702_v0  ;;  %vm1694_vm13 = vcmp.gt.s32.totalorder %v1692_v6, %v1693_v37 }
0x114b   : > { %v1706_v2 = vand.u32 7, %v1704_v59  ;;  %vm1710_vm14 = vcmp.eq.s32.totalorder %v1686_v58, %v1704_v59  ;;  %v1695_v56 = vsel %vm1694_vm13, %v1692_v6, %v1693_v37 }
0x114c   : > { %2434 = vmatprep.subr.msk.mxu0 %vm1710_vm14, %v2889_v7  ;;  %v1705_v8 = vand.u32 7, %v1695_v56  ;;  %vm1709_vm0 = vcmp.eq.s32.totalorder %v1685_v23, %v1695_v56 }
0x114d   : > { %v1708_v41 = vsub.s32 7, %v1706_v2  ;;  %2435 = vmatpush1.msk.msra.mxu0 %vm1709_vm0, %v2889_v7 }
0x114e   : > { %v1707_v35 = vsub.s32 7, %v1705_v8  ;;  %2436 = vmatmul.mubr.msk.f32.vlgmr.msra.gmra.mrb[4].mxu0 %vm1754_vm15, %v1738_v53 }
0x1150   : > { %v2009_v10 = vcombine.low %v1707_v35, %v1708_v41 }
0x1152   : > { %v2016_v55 = vrot.slane %v2009_v10, %v3478_v17 }
0x1154   : > { %v2023_v9 = vrot.slane %v2016_v55, %v3478_v17 }
0x1156   : > { %2024 = vst.msk [vmem:[%s3915_s27] sm:$0x3] %vm3501_vm7, %v2023_v9  ;;  %s2694_s27 = scalar_lea.vmem %s2693_s19, 64 }
0x1157   : > { %p2696_p0 = scmp.lt.s32.totalorder %s2694_s27, %s2688_s16 }
0x1159   : > { %p2697_p2 = por %p2696_p0, %p2695_p10 }
0x115b   : > { %p2698_p4 = pnand %p2697_p2, %p2691_p8 }
0x115d   : > { %2701 = shalt.err (!%p2698_p4)
}
0x115e   : > { %s2702_s21 = scalar_lea.hbm %s3528_s13, 32  ;;  %s2706_s18 = scalar_lea.hbm %s3905_s11, 64 }
0x115f   : > { %p2703_p5 = scmp.ne.s32.totalorder %s3528_s13, %s2702_s21  ;;  %p2707_p1 = scmp.lt.u32.totalorder %s3528_s13, %s3905_s11 }
0x1160   : > { %p2708_p3 = scmp.lt.u32.totalorder %s2706_s18, %s2702_s21  ;;  %p2710_p6 = scmp.lt.u32.totalorder %s2702_s21, %s3528_s13 }
0x1161   : > { %p2704_p7 = pnand %p2703_p5, %p3930_p12 }
0x1162   : > { %p2709_p11 = por %p2708_p3, %p2707_p1 }
0x1163   : > { %p2705_p9 = pneg %p2704_p7 }
0x1164   : > { %p2711_p13 = por %p2710_p6, %p2709_p11 }
0x1166   : > { %p2712_p8 = pnand %p2711_p13, %p2705_p9 }
0x1168   : > { %2715 = shalt.err (!%p2712_p8)
}
0x1169   : > { %2474 = dma.vmem_to_hbm [thread:$0]  (%p3930_p12), %s2105_s28, 32, %s3528_s13, %s3534_s23  }
0x116a   : > { %s3558_s30 = scalar_lea.hbm %s3906_s12, %s3522_s20  ;;  %s3931_s15 = scalar_lea.vmem [#allocation11], %s3492_s29 }
0x116b   : > { %s2118_s26 = sshll.u32 %s3931_s15, 4  ;;  %s2891_s18 = smov [#allocation11]   ;;  %s2119_s26 = int_to_ptr.vmem [resolvable:$true] %s2118_s26 }
0x116c   : > { %s2716_s21 = scalar_lea.vmem %s2119_s26, 32  ;;  %s2720_s19 = sshll.u32 %s2891_s18, 4  ;;  %s2721_s19 = int_to_ptr.vmem [resolvable:$false] %s2720_s19 }
0x116d   : > { %p2717_p10 = scmp.ne.s32.totalorder %s2119_s26, %s2716_s21  ;;  %s2722_s0 = scalar_lea.vmem %s2721_s19, 64 }
0x116e   : > { %p2723_p4 = scmp.lt.s32.totalorder %s2119_s26, %s2721_s19  ;;  %p2724_p5 = scmp.lt.s32.totalorder %s2722_s0, %s2716_s21 }
0x116f   : > { %p2718_p0 = pnand %p2717_p10, %p3930_p12 }
0x1170   : > { %p2725_p7 = por %p2724_p5, %p2723_p4 }
0x1171   : > { %p2719_p2 = pneg %p2718_p0 }
0x1173   : > { %p2726_p9 = pnand %p2725_p7, %p2719_p2 }
0x1175   : > { %2729 = shalt.err (!%p2726_p9)
}
0x1176   : > { %s2730_s13 = scalar_lea.hbm %s3558_s30, 32  ;;  %s2734_s16 = scalar_lea.hbm %s3906_s12, 64 }
0x1177   : > { %p2731_p1 = scmp.ne.s32.totalorder %s3558_s30, %s2730_s13  ;;  %p2735_p6 = scmp.lt.u32.totalorder %s3558_s30, %s3906_s12 }
0x1178   : > { %p2736_p13 = scmp.lt.u32.totalorder %s2734_s16, %s2730_s13  ;;  %p2738_p10 = scmp.lt.u32.totalorder %s2730_s13, %s3558_s30 }
0x1179   : > { %p2732_p3 = pnand %p2731_p1, %p3930_p12 }
0x117a   : > { %p2737_p8 = por %p2736_p13, %p2735_p6 }
0x117b   : > { %p2733_p11 = pneg %p2732_p3 }
0x117c   : > { %p2739_p0 = por %p2738_p10, %p2737_p8 }
0x117e   : > { %p2740_p2 = pnand %p2739_p0, %p2733_p11 }
0x1180   : > { %2743 = shalt.err (!%p2740_p2)
}
0x1181   : > { %2475 = dma.vmem_to_hbm [thread:$0]  (%p3930_p12), %s2119_s26, 32, %s3558_s30, %s3534_s23   ;;  %v3592_v36 = vadd.s32 8, %v3260_v43  ;;  %v3595_v44 = vadd.s32 16, %v3260_v43 }
0x1182   : > { %s2388_s0 = sshll.u32 %s3062_s17, 3  ;;  %s2454_s21 = sshll.u32 %s2983_s25, 7 }
0x1183   : > { %s525_s19 = scalar_lea.vmem [#allocation6], %s2388_s0  ;;  %s3587_s26 = scalar_lea.hbm %s3903_s9, %s2454_s21 }
0x1184   : > { %s2074_s13 = sshll.u32 %s525_s19, 4  ;;  %s3932_s28 = sand.u32 1, %s2983_s25   ;;  %s3589_s13 = int_to_ptr.vmem [resolvable:$true] %s2074_s13 }
0x1185   : > { %s3599_s27 = scalar_lea.sflag [#allocation7], %s3932_s28  ;;  %s2744_s16 = scalar_lea.vmem %s3589_s13, 128 }
0x1186   : > { %p2745_p4 = scmp.ne.s32.totalorder %s3589_s13, %s2744_s16  ;;  %s2892_s15 = smov [#allocation6]  }
0x1187   : > { %s2748_s18 = sshll.u32 %s2892_s15, 4  ;;  %s2749_s18 = int_to_ptr.vmem [resolvable:$false] %s2748_s18 }
0x1188   : > { %p2746_p5 = pnand %p2745_p4, %p3930_p12  ;;  %s2750_s0 = scalar_lea.vmem %s2749_s18, 256 }
0x1189   : > { %p2751_p9 = scmp.lt.s32.totalorder %s3589_s13, %s2749_s18  ;;  %p2752_p1 = scmp.lt.s32.totalorder %s2750_s0, %s2744_s16 }
0x118a   : > { %p2747_p7 = pneg %p2746_p5 }
0x118b   : > { %p2753_p3 = por %p2752_p1, %p2751_p9 }
0x118d   : > { %p2754_p11 = pnand %p2753_p3, %p2747_p7 }
0x11c8   : > { %v1849_v21 = vpop.xlane.xlu0 %1848 }
0x11c9   : > { %v1844_v48 = vpop.xlane.xlu1 %1843 }
0x11ca   : > { %v1850_v20 = vadd.f32 1e-09, %v1844_v48 }
0x11cc   : > { %2654 = vrcp.f32 %v1850_v20 }
0x11d6   : > { %v2655_v27 = vpop.eup %2654 }
0x11d7   : > { %v1852_v32 = vmul.f32 %v2655_v27, %v1849_v21 }
0x11d9   : > { %v1853_v24 = vmul.f32 %v1852_v32, %v3489_v18  ;;  %v1854_v25 = vmul.f32 %v1852_v32, %v3495_v3 }
0x11db   : > { %v1855_v12 = vrot.slane %v1853_v24, 4  ;;  %v1861_v5 = vrot.slane %v1854_v25, 4 }
0x11dd   : > { %v1856_v33 = vmax.f32 %v1853_v24, %v1855_v12  ;;  %v1862_v30 = vmax.f32 %v1854_v25, %v1861_v5 }
0x11df   : > { %v1857_v26 = vrot.slane %v1856_v33, 2 }
0x11e1   : > { %v1858_v49 = vmax.f32 %v1856_v33, %v1857_v26 }
0x11e3   : > { %v1859_v42 = vrot.slane %v1858_v49, 1 }
0x1221   : > { %v1824_v54 = vpop.f32.mrb[4].mxu0 }
0x1222   : > { %v2464_v62 = vtrunc.f32 %v1824_v54  ;;  %v1826_v28 = vpop.f32.mrb[5].mxu0 }
0x1223   : > { %v1831_v52 = vcombine.low %v1824_v54, %v1826_v28  ;;  %v2466_v51 = vtrunc.f32 %v1826_v28 }
0x1224   : > { %v2465_v31 = vcvt.f32.s32 %v2464_v62 }
0x1225   : > { %1833 = vst [vmem:[%s525_s19] sm:$0xff] %v1831_v52  ;;  %v2467_v34 = vcvt.f32.s32 %v2466_v51 }
0x1226   : > { %vm1836_vm1 = vcmp.gt.s32.totalorder %v2465_v31, 0 }
0x1227   : > { %2757 = shalt.err (!%p2754_p11)
}
0x1228   : > { %s2758_s21 = scalar_lea.hbm %s3587_s26, 128  ;;  %s2762_s30 = scalar_lea.hbm %s3903_s9, 256 }
0x1229   : > { %p2759_p6 = scmp.ne.s32.totalorder %s3587_s26, %s2758_s21  ;;  %p2763_p10 = scmp.lt.u32.totalorder %s3587_s26, %s3903_s9 }
0x122a   : > { %p2764_p0 = scmp.lt.u32.totalorder %s2762_s30, %s2758_s21  ;;  %p2766_p4 = scmp.lt.u32.totalorder %s2758_s21, %s3587_s26 }
0x122b   : > { %p2760_p13 = pnand %p2759_p6, %p3930_p12 }
0x122c   : > { %p2765_p2 = por %p2764_p0, %p2763_p10 }
0x122d   : > { %p2761_p8 = pneg %p2760_p13 }
0x122e   : > { %p2767_p5 = por %p2766_p4, %p2765_p2 }
0x1230   : > { %p2768_p7 = pnand %p2767_p5, %p2761_p8 }
0x1232   : > { %2771 = shalt.err (!%p2768_p7)
}
0x1233   : > { %2472 = dma.vmem_to_hbm [thread:$0]  (%p3930_p12), %s3589_s13, 128, %s3587_s26, %s3599_s27   ;;  %v1837_v45 = vsel %vm1836_vm1, %v2465_v31, 0  ;;  %v3625_v47 = vadd.s32 24, %v3260_v43  ;;  %vm1838_vm2 = vcmp.gt.s32.totalorder %v2467_v34, 0  ;;  %v1863_v18 = vrot.slane %v1862_v30, 2 }
0x1234   : > { %v3628_v4 = vadd.s32 32, %v3260_v43  ;;  %v1879_v61 = vrot.slane %v1837_v45, %v3288_v57  ;;  %v1839_v3 = vsel %vm1838_vm2, %v2467_v34, 0  ;;  %vm1904_vm3 = vcmp.gt.f32.partialorder %v3480_v38, 0.0  ;;  %s3933_s13 = smul.u32 160, %s3062_s17  ;;  %s518_s16 = scalar_lea.vmem [#allocation5], %s3492_s29 }
0x1235   : > { %v3633_v40 = vadd.s32 40, %v3260_v43  ;;  %v3636_v50 = vadd.s32 48, %v3260_v43  ;;  %v1970_v13 = vcombine.high %v1837_v45, %v1839_v3  ;;  %v3638_v11 = vmax.f32 %v1858_v49, %v1859_v42  ;;  %s2060_s18 = sshll.u32 %s518_s16, 4  ;;  %s3712_s21 = scalar_lea.hbm %s3902_s8, %s3522_s20  ;;  %s3714_s18 = int_to_ptr.vmem [resolvable:$true] %s2060_s18 }
0x1236   : > { %vm1884_vm4 = vcmp.eq.s32.totalorder %v3260_v43, %v1879_v61  ;;  %vm1886_vm5 = vcmp.eq.s32.totalorder %v3592_v36, %v1879_v61  ;;  %vm1888_vm6 = vcmp.eq.s32.totalorder %v3595_v44, %v1879_v61  ;;  %v3644_v19 = vadd.s32 56, %v3260_v43  ;;  %s3665_s26 = scalar_lea.vmem [#allocation8], %s3933_s13  ;;  %s2026_s20 = scalar_lea.sflag [#allocation4], %s3062_s17 }
0x1237   : > { %vm1890_vm8 = vcmp.eq.s32.totalorder %v3625_v47, %v1879_v61  ;;  %vm1910_vm9 = vmand %vm1884_vm4, %vm1904_vm3  ;;  %v1864_v16 = vmax.f32 %v1862_v30, %v1863_v18  ;;  %v3650_v58 = vadd.s32 64, %v3260_v43  ;;  %vm1892_vm10 = vcmp.eq.s32.totalorder %v3628_v4, %v1879_v61  ;;  %s2772_s19 = scalar_lea.vmem %s3714_s18, 32  ;;  %s2893_s23 = smov [#allocation5]  }
0x1238   : > { %vm1912_vm11 = vmand %vm1886_vm5, %vm1904_vm3  ;;  %v1930_v23 = vsel %vm1910_vm9, %v3638_v11, 0.0  ;;  %v3657_v60 = vadd.s32 72, %v3260_v43  ;;  %vm1894_vm12 = vcmp.eq.s32.totalorder %v3633_v40, %v1879_v61  ;;  %vm1896_vm14 = vcmp.eq.s32.totalorder %v3636_v50, %v1879_v61  ;;  %p2773_p9 = scmp.ne.s32.totalorder %s3714_s18, %s2772_s19  ;;  %s2776_s30 = sshll.u32 %s2893_s23, 4  ;;  %s2777_s30 = int_to_ptr.vmem [resolvable:$false] %s2776_s30 }
0x1239   : > { %vm1914_vm13 = vmand %vm1888_vm6, %vm1904_vm3  ;;  %v1932_v22 = vsel %vm1912_vm11, %v3638_v11, 0.0  ;;  %1950 = vst [vmem:[%s3665_s26] sm:$0xff] %v1930_v23  ;;  %v3674_v14 = vrot.slane %v1839_v3, %v3288_v57  ;;  %vm1898_vm0 = vcmp.eq.s32.totalorder %v3644_v19, %v1879_v61  ;;  %v1865_v1 = vrot.slane %v1864_v16, 1  ;;  %s2778_s28 = scalar_lea.vmem %s2777_s30, 64  ;;  %p2779_p11 = scmp.lt.s32.totalorder %s3714_s18, %s2777_s30 }
0x123a   : > { %vm1916_vm15 = vmand %vm1890_vm8, %vm1904_vm3  ;;  %v1934_v46 = vsel %vm1914_vm13, %v3638_v11, 0.0  ;;  %1952 = vst [vmem:[%s3665_s26 + $0x10] sm:$0xff] %v1932_v22  ;;  %vm1900_vm2 = vcmp.eq.s32.totalorder %v3650_v58, %v1879_v61  ;;  %v1977_v63 = vrot.slane %v1970_v13, %v3478_v17  ;;  %vm1902_vm5 = vcmp.eq.s32.totalorder %v3657_v60, %v1879_v61  ;;  %p2774_p1 = pnand %p2773_p9, %p3930_p12  ;;  %p2780_p6 = scmp.lt.s32.totalorder %s2778_s28, %s2772_s19 }
0x123b   : > { %vm1918_vm1 = vmand %vm1892_vm10, %vm1904_vm3  ;;  %v1936_v29 = vsel %vm1916_vm15, %v3638_v11, 0.0  ;;  %1954 = vst [vmem:[%s3665_s26 + $0x20] sm:$0xff] %v1934_v46  ;;  %vm1885_vm9 = vcmp.eq.s32.totalorder %v3260_v43, %v3674_v14  ;;  %vm1887_vm11 = vcmp.eq.s32.totalorder %v3592_v36, %v3674_v14 }
0x123c   : > { %vm1920_vm4 = vmand %vm1894_vm12, %vm1904_vm3  ;;  %v1938_v57 = vsel %vm1918_vm1, %v3638_v11, 0.0  ;;  %1956 = vst [vmem:[%s3665_s26 + $0x30] sm:$0xff] %v1936_v29  ;;  %v1984_v37 = vrot.slane %v1977_v63, %v3478_v17  ;;  %vm1905_vm12 = vcmp.gt.f32.partialorder %v3482_v39, 0.0  ;;  %v3725_v17 = vmax.f32 %v1864_v16, %v1865_v1  ;;  %p2775_p3 = pneg %p2774_p1  ;;  %p2781_p13 = por %p2780_p6, %p2779_p11 }
0x123d   : > { %vm1922_vm6 = vmand %vm1896_vm14, %vm1904_vm3  ;;  %v1940_v0 = vsel %vm1920_vm4, %v3638_v11, 0.0  ;;  %1958 = vst [vmem:[%s3665_s26 + $0x40] sm:$0xff] %v1938_v57  ;;  %vm1889_vm14 = vcmp.eq.s32.totalorder %v3595_v44, %v3674_v14 }
0x123e   : > { %vm1924_vm8 = vmand %vm1898_vm0, %vm1904_vm3  ;;  %v1942_v6 = vsel %vm1922_vm6, %v3638_v11, 0.0  ;;  %1960 = vst [vmem:[%s3665_s26 + $0x50] sm:$0xff] %v1940_v0  ;;  %p2782_p8 = pnand %p2781_p13, %p2775_p3 }
0x123f   : > { %vm1926_vm10 = vmand %vm1900_vm2, %vm1904_vm3  ;;  %v1944_v59 = vsel %vm1924_vm8, %v3638_v11, 0.0  ;;  %1962 = vst [vmem:[%s3665_s26 + $0x60] sm:$0xff] %v1942_v6 }
0x1240   : > { %vm3731_vm13 = vmand %vm1902_vm5, %vm1904_vm3  ;;  %v1946_v53 = vsel %vm1926_vm10, %v3638_v11, 0.0  ;;  %1964 = vst [vmem:[%s3665_s26 + $0x70] sm:$0xff] %v1944_v59  ;;  %vm1891_vm3 = vcmp.eq.s32.totalorder %v3625_v47, %v3674_v14 }
0x1241   : > { %1989 = vst.msk [vmem:[%s518_s16] sm:$0x3] %vm3501_vm7, %v1984_v37  ;;  %v1948_v38 = vsel %vm3731_vm13, %v3638_v11, 0.0  ;;  %1966 = vst [vmem:[%s3665_s26 + $0x80] sm:$0xff] %v1946_v53 }
0x1242   : > { %vm3752_vm15 = vmand %vm1885_vm9, %vm1905_vm12 }
0x1243   : > { %2785 = shalt.err (!%p2782_p8)
}
0x1244   : > { %s2786_s17 = scalar_lea.hbm %s3712_s21, 32  ;;  %s2790_s16 = scalar_lea.hbm %s3902_s8, 64 }
0x1245   : > { %p2787_p10 = scmp.ne.s32.totalorder %s3712_s21, %s2786_s17  ;;  %p2791_p4 = scmp.lt.u32.totalorder %s3712_s21, %s3902_s8 }
0x1246   : > { %p2792_p5 = scmp.lt.u32.totalorder %s2790_s16, %s2786_s17  ;;  %p2794_p9 = scmp.lt.u32.totalorder %s2786_s17, %s3712_s21 }
0x1247   : > { %p2788_p0 = pnand %p2787_p10, %p3930_p12 }
0x1248   : > { %p2793_p7 = por %p2792_p5, %p2791_p4 }
0x1249   : > { %p2789_p2 = pneg %p2788_p0 }
0x124a   : > { %p2795_p1 = por %p2794_p9, %p2793_p7 }
0x124c   : > { %p2796_p3 = pnand %p2795_p1, %p2789_p2 }
0x124e   : > { %2799 = shalt.err (!%p2796_p3)
}
0x124f   : > { %2471 = dma.vmem_to_hbm [thread:$0]  (%p3930_p12), %s3714_s18, 32, %s3712_s21, %s2026_s20   ;;  %1968 = vst [vmem:[%s3665_s26 + $0x90] sm:$0xff] %v1948_v38  ;;  %vm1893_vm7 = vcmp.eq.s32.totalorder %v3628_v4, %v3674_v14  ;;  %vm1913_vm0 = vmand %vm1887_vm11, %vm1905_vm12  ;;  %v1931_v43 = vsel %vm3752_vm15, %v3725_v17, 0.0  ;;  %vm1895_vm1 = vcmp.eq.s32.totalorder %v3633_v40, %v3674_v14  ;;  %vm1897_vm4 = vcmp.eq.s32.totalorder %v3636_v50, %v3674_v14 }
0x1250   : > { %vm1915_vm2 = vmand %vm1889_vm14, %vm1905_vm12  ;;  %v1933_v15 = vsel %vm1913_vm0, %v3725_v17, 0.0  ;;  %1951 = vst [vmem:[%s3665_s26 + $0x8] sm:$0xff] %v1931_v43  ;;  %vm1899_vm6 = vcmp.eq.s32.totalorder %v3644_v19, %v3674_v14  ;;  %s2468_s18 = smul.u32 2560, %s2983_s25  ;;  %vm1901_vm9 = vcmp.eq.s32.totalorder %v3650_v58, %v3674_v14  ;;  %s2087_s21 = sshll.u32 %s3665_s26, 4  ;;  %vm1903_vm11 = vcmp.eq.s32.totalorder %v3657_v60, %v3674_v14  ;;  %s3843_s21 = int_to_ptr.vmem [resolvable:$true] %s2087_s21 }
0x1251   : > { %vm1917_vm5 = vmand %vm1891_vm3, %vm1905_vm12  ;;  %v1935_v7 = vsel %vm1915_vm2, %v3725_v17, 0.0  ;;  %1953 = vst [vmem:[%s3665_s26 + $0x18] sm:$0xff] %v1933_v15  ;;  %s2800_s23 = scalar_lea.vmem %s3843_s21, 2560  ;;  %s2894_s30 = smov [#allocation8]  }
0x1252   : > { %vm1919_vm8 = vmand %vm1893_vm7, %vm1905_vm12  ;;  %v1937_v8 = vsel %vm1917_vm5, %v3725_v17, 0.0  ;;  %1955 = vst [vmem:[%s3665_s26 + $0x28] sm:$0xff] %v1935_v7  ;;  %s3841_s19 = scalar_lea.hbm %s3904_s10, %s2468_s18  ;;  %p2801_p11 = scmp.ne.s32.totalorder %s3843_s21, %s2800_s23 }
0x1253   : > { %vm1921_vm10 = vmand %vm1895_vm1, %vm1905_vm12  ;;  %v1939_v41 = vsel %vm1919_vm8, %v3725_v17, 0.0  ;;  %1957 = vst [vmem:[%s3665_s26 + $0x38] sm:$0xff] %v1937_v8  ;;  %s2804_s28 = sshll.u32 %s2894_s30, 4  ;;  %s2805_s28 = int_to_ptr.vmem [resolvable:$false] %s2804_s28 }
0x1254   : > { %vm1923_vm13 = vmand %vm1897_vm4, %vm1905_vm12  ;;  %v1941_v35 = vsel %vm1921_vm10, %v3725_v17, 0.0  ;;  %1959 = vst [vmem:[%s3665_s26 + $0x48] sm:$0xff] %v1939_v41  ;;  %p2802_p6 = pnand %p2801_p11, %p3930_p12  ;;  %s2806_s17 = scalar_lea.vmem %s2805_s28, 5120 }
0x1255   : > { %vm1925_vm14 = vmand %vm1899_vm6, %vm1905_vm12  ;;  %v1943_v10 = vsel %vm1923_vm13, %v3725_v17, 0.0  ;;  %1961 = vst [vmem:[%s3665_s26 + $0x58] sm:$0xff] %v1941_v35  ;;  %p2807_p8 = scmp.lt.s32.totalorder %s3843_s21, %s2805_s28  ;;  %p2808_p10 = scmp.lt.s32.totalorder %s2806_s17, %s2800_s23 }
0x1256   : > { %vm1927_vm3 = vmand %vm1901_vm9, %vm1905_vm12  ;;  %v1945_v55 = vsel %vm1925_vm14, %v3725_v17, 0.0  ;;  %1963 = vst [vmem:[%s3665_s26 + $0x68] sm:$0xff] %v1943_v10  ;;  %p2803_p13 = pneg %p2802_p6 }
0x1257   : > { %vm1929_vm15 = vmand %vm1903_vm11, %vm1905_vm12  ;;  %v1947_v9 = vsel %vm1927_vm3, %v3725_v17, 0.0  ;;  %1965 = vst [vmem:[%s3665_s26 + $0x78] sm:$0xff] %v1945_v55  ;;  %p2809_p0 = por %p2808_p10, %p2807_p8 }
0x1258   : > { %v1949_v48 = vsel %vm1929_vm15, %v3725_v17, 0.0  ;;  %1967 = vst [vmem:[%s3665_s26 + $0x88] sm:$0xff] %v1947_v9 }
0x1259   : > { %1969 = vst [vmem:[%s3665_s26 + $0x98] sm:$0xff] %v1949_v48  ;;  %p2810_p2 = pnand %p2809_p0, %p2803_p13 }
0x125b   : > { %2813 = shalt.err (!%p2810_p2)
}
0x125c   : > { %s2814_s26 = scalar_lea.hbm %s3841_s19, 2560  ;;  %s2818_s16 = scalar_lea.hbm %s3904_s10, 5120 }
0x125d   : > { %p2815_p4 = scmp.ne.s32.totalorder %s3841_s19, %s2814_s26  ;;  %p2819_p9 = scmp.lt.u32.totalorder %s3841_s19, %s3904_s10 }
0x125e   : > { %p2820_p1 = scmp.lt.u32.totalorder %s2818_s16, %s2814_s26  ;;  %p2822_p11 = scmp.lt.u32.totalorder %s2814_s26, %s3841_s19 }
0x125f   : > { %p2816_p5 = pnand %p2815_p4, %p3930_p12 }
0x1260   : > { %p2821_p3 = por %p2820_p1, %p2819_p9 }
0x1261   : > { %p2817_p7 = pneg %p2816_p5 }
0x1262   : > { %p2823_p6 = por %p2822_p11, %p2821_p3 }
0x1264   : > { %p2824_p13 = pnand %p2823_p6, %p2817_p7 }
0x1266   : > { %2827 = shalt.err (!%p2824_p13)
}
0x1267   : > { %s2895_s18 = smov 256   ;;  %s2896_s25 = smov 16  }
0x1268   : > { %2473 = dma.vmem_to_hbm [thread:$0]  (%p3930_p12), %s3843_s21, 2560, %s3841_s19, %s3599_s27, %s2895_s18, %s2895_s18, %s2896_s25  }
0x1269 PF: > { %s3938_s20 = sld [smem:[#allocation16_spill]]  ;;  %s3939_s23 = sld [smem:[#allocation20_spill]] }
0x126a   : > { %p3941_p10 = scmp.ge.s32.totalorder %s2874_s24, 2 }
0x126f   : > { %s2130_s30 = sand.u32 1, %s3938_s20   ;;  %p3940_p8 = scmp.ne.s32.totalorder %s3939_s23, 0 }
0x1270   : > { %s2131_s28 = scalar_lea.sflag [#allocation4], %s2130_s30 }
0x1271   : > { %p2486_p0 = pnand %p3941_p10, %p3940_p8 }
0x1273   : > { %2849 = dma.done.wait (!%p2486_p0), %s2131_s28, 32  }
0x1274   : > { %2851 = vsyncadd (!%p2486_p0), %s2131_s28, 4294967264  ;;  %s3942_s17 = sadd.s32 4294967294, %s2874_s24  }
0x1275   : > { %s2139_s26 = sand.u32 1, %s3942_s17  }
0x1276   : > { %s2140_s15 = scalar_lea.sflag [#allocation7], %s2139_s26 }
0x1277   : > { %2853 = dma.done.wait (!%p2486_p0), %s2140_s15, 2688  }
0x1278   : > { %2855 = vsyncadd (!%p2486_p0), %s2140_s15, 4294964608  ;;  %s2158_s13 = scalar_lea.sflag [#allocation10], %s2139_s26 }
0x1279   : > { %2857 = dma.done.wait (!%p2486_p0), %s2158_s13, 64  }
0x127a   : > { %2859 = vsyncadd (!%p2486_p0), %s2158_s13, 4294967232  ;;  %s3943_s24 = sld [smem:[#allocation18_spill]]  ;;  %s3944_s14 = sld [smem:[#allocation17_spill]] }
0x127b   : > { %s3945_s23 = sld [smem:[#allocation19_spill]]  ;;  %s3946_s21 = smov %s2866_s22 }
0x1280   : > { %p32_p12 = scmp.ge.s32.totalorder %s3943_s24, 4   ;;  %s3947_s22 = smov %s3944_s14 }
0x1282   :  { %34 = sbr.rel (!%p32_p12) target bundleno = 11 (0xb), region = 179 }
0x1289   :  { %2172 = vsyncpa [#allocation3], 1 }
0x128a   :  { %2174 = vsyncpa [#allocation3 + $0x1], 1 }
0x128b   :  { %2175 = vsyncpa [#allocation4], 1 }
0x128c   :  { %2177 = vsyncpa [#allocation4 + $0x1], 1 }
0x128d   :  { %2178 = vsyncpa [#allocation7], 1 }
0x128e   :  { %2180 = vsyncpa [#allocation7 + $0x1], 1 }
0x128f   :  { %2181 = vsyncpa [#allocation10], 1 }
0x1290   :  { %2183 = vsyncpa [#allocation10 + $0x1], 1 }

</bundles_post_ra>
